<compile_context>
chip_gen: v7x
topology: tpu7x:2x2x1
jax: 0.10.0
libtpu: 0.0.40
codegen_flags: <defaults>
</compile_context>

<pallas_src>
import jax
import jax.numpy as jnp
from jax.experimental import pallas as pl
from jax.experimental.pallas import tpu as pltpu

NEG_SLOPE = 0.01      # nn.LeakyReLU default negative_slope
HINT_DIM = 64         # nn.Linear(42, 64) adapter width
K1 = 5                # first conv kernel size (all branches)
K2PAD = 7             # conv2 kernel sizes (3, 5, 7) padded to 7 for packing


def _leaky_relu(x):
    return jnp.where(x >= 0, x, NEG_SLOPE * x)


def _conv_out_len(l_in, k, stride, pad, dil):
    return (l_in + 2 * pad - dil * (k - 1) - 1) // stride + 1


# ---------------------------------------------------------------------------
# Fused kernel
# ---------------------------------------------------------------------------

def _make_fused_kernel(Bb, L, C, lout1, branch_cfgs):
    """branch_cfgs[e] = (k2, stride2, dil2, lout2) for encoder e."""
    F = 3 * C

    def kernel(x_ref, w1s_ref, b1s_ref, w2s_ref, b2s_ref,
               wcat_ref, bcat_ref, w2h_ref, b2h_ref,
               feat_ref, hint_ref, pred_ref,
               xpad_ref, mid_ref):

        def conv_im2col(src_ref, w_im, bias, taps, stride, dil, lout):
            # out[t, co] = bias[co]
            #   + sum_{k,ci} src[stride*t + dil*k, ci] * w_im[k*C + ci, co]
            pieces = [src_ref[pl.ds(dil * k, lout, stride=stride), :]
                      for k in range(taps)]
            patches = jnp.concatenate(pieces, axis=-1)              # (lout, taps*C)
            y = jnp.dot(patches, w_im,
                        preferred_element_type=jnp.float32) + bias
            return _leaky_relu(y)                                    # (lout, C)

        # ---- zero only the padding rows, once (pad=1 on every conv) ----
        zrow = jnp.zeros((1, C), jnp.float32)
        xpad_ref[0:1, :] = zrow
        xpad_ref[L + 1:L + 2, :] = zrow
        mid_ref[0:1, :] = zrow
        mid_ref[lout1 + 1:lout1 + 2, :] = zrow

        # ---- hoist packed-weight loads out of the row loop ----
        w1_im = [w1s_ref[e] for e in range(3)]                       # (K1*C, C)
        b1_v = [b1s_ref[e:e + 1, :] for e in range(3)]               # (1, C)
        w2_im = [w2s_ref[e][:branch_cfgs[e][0] * C, :] for e in range(3)]
        b2_v = [b2s_ref[e:e + 1, :] for e in range(3)]               # (1, C)

        # ---- encoders: all Bb rows handled inside this single grid step ----
        rows = []
        for b in range(Bb):
            xpad_ref[1:L + 1, :] = x_ref[b]                          # (L, C)
            feas = []
            for e in range(3):
                k2, s2, d2, lo2 = branch_cfgs[e]
                h1 = conv_im2col(xpad_ref, w1_im[e], b1_v[e], K1, 2, 1, lout1)
                mid_ref[1:lout1 + 1, :] = h1
                h2 = conv_im2col(mid_ref, w2_im[e], b2_v[e], k2, s2, d2, lo2)
                # MaxPool1d(kernel_size == lout2): one window over full length.
                feas.append(jnp.max(h2, axis=0, keepdims=True))      # (1, C)
            rows.append(jnp.concatenate(feas, axis=-1))              # (1, 3C)  e*C+c
        blocked = jnp.concatenate(rows, axis=0)                      # (Bb, 3C)

        # ---- torch Flatten(cat(f1,f2,f3, dim=2)): feature index c*3 + e ----
        ri = jax.lax.broadcasted_iota(jnp.int32, (F, F), 0)
        ci = jax.lax.broadcasted_iota(jnp.int32, (F, F), 1)
        e_of = (ri >= C).astype(jnp.int32) + (ri >= 2 * C).astype(jnp.int32)
        c_of = ri - e_of * C
        perm = (ci == c_of * 3 + e_of).astype(jnp.float32)
        features = jnp.dot(blocked, perm, preferred_element_type=jnp.float32)
        feat_ref[...] = features

        # ---- head: adapter and regressor layer 1 share one matmul ----
        hh = jnp.dot(features, wcat_ref[...],
                     preferred_element_type=jnp.float32) + bcat_ref[...]
        hint_ref[...] = hh[:, :HINT_DIM]
        hreg = _leaky_relu(hh[:, HINT_DIM:])
        # TODO(synk): nn.Dropout(p) is identity at inference; no training mask.
        pred_ref[...] = jnp.dot(hreg, w2h_ref[...],
                                preferred_element_type=jnp.float32) + b2h_ref[...]

    return kernel


# ---------------------------------------------------------------------------
# Wrapper: layout prep + single pallas_call
# ---------------------------------------------------------------------------

def cnn_rul_forward(x_ncl, params):
    B, C, L = x_ncl.shape
    hidden = params["reg_w1"].shape[0]
    assert params["adapter_w"].shape[1] == 3 * C, "adapter expects 3*input_dim feats"

    lout1 = _conv_out_len(L, K1, 2, 1, 1)
    conv2_cfgs = ((3, 2, 1, 4), (5, 2, 1, 2), (7, 2, 1, 1))   # (k, stride, pad, dil)
    pool_ks = (4, 4, 5)
    branch_cfgs = []
    for (k2, s2, p2, d2), pk in zip(conv2_cfgs, pool_ks):
        lo2 = _conv_out_len(lout1, k2, s2, p2, d2)
        assert lo2 == pk, "MaxPool window must cover the conv2 output exactly"
        branch_cfgs.append((k2, s2, d2, lo2))
    branch_cfgs = tuple(branch_cfgs)

    # Static bounds for the strided VMEM reads (no runtime OOB check on VMEM).
    assert (K1 - 1) + 2 * (lout1 - 1) < L + 2
    for (k2, s2, d2, lo2) in branch_cfgs:
        assert d2 * (k2 - 1) + s2 * (lo2 - 1) < lout1 + 2

    # Batch blocking: Bb rows per grid step (grid=(1,) for small batches).
    if B <= 16:
        Bb = B
    else:
        assert B % 8 == 0, "for B > 16 this wrapper requires B % 8 == 0"
        Bb = 8
    grid = (B // Bb,)

    # ---- layout prep (tiny XLA ops, fused into the surrounding jit) ----
    x_blc = jnp.transpose(x_ncl, (0, 2, 1))                    # NCL -> NLC

    w1_l, b1_l, w2_l, b2_l = [], [], [], []
    for e in (1, 2, 3):
        w1 = params[f"enc{e}_w1"]                              # (Cout, Cin, 5)
        w1_l.append(jnp.transpose(w1, (2, 1, 0)).reshape(K1 * C, C))
        b1_l.append(params[f"enc{e}_b1"])
        w2 = params[f"enc{e}_w2"]                              # (Cout, Cin, k_e)
        k_e = w2.shape[2]
        w2im = jnp.transpose(w2, (2, 1, 0)).reshape(k_e * C, C)
        w2_l.append(jnp.pad(w2im, ((0, (K2PAD - k_e) * C), (0, 0))))
        b2_l.append(params[f"enc{e}_b2"])
    w1s, b1s = jnp.stack(w1_l), jnp.stack(b1_l)                # (3, 5C, C), (3, C)
    w2s, b2s = jnp.stack(w2_l), jnp.stack(b2_l)                # (3, 7C, C), (3, C)

    wcat = jnp.concatenate([params["adapter_w"].T, params["reg_w1"].T], axis=1)
    bcat = jnp.concatenate([params["adapter_b"], params["reg_b1"]])[None, :]
    w2h = params["reg_w2"].T                                   # (hidden, 1)
    b2h = params["reg_b2"][None, :]                            # (1, 1)

    F = 3 * C
    Hcat = HINT_DIM + hidden
    kernel = _make_fused_kernel(Bb, L, C, lout1, branch_cfgs)

    features, hint, pred = pl.pallas_call(
        kernel,
        out_shape=(jax.ShapeDtypeStruct((B, F), jnp.float32),
                   jax.ShapeDtypeStruct((B, HINT_DIM), jnp.float32),
                   jax.ShapeDtypeStruct((B, 1), jnp.float32)),
        grid=grid,
        in_specs=[
            pl.BlockSpec((Bb, L, C), lambda i: (i, 0, 0)),          # x block
            pl.BlockSpec((3, K1 * C, C), lambda i: (0, 0, 0)),      # packed conv1 w
            pl.BlockSpec((3, C), lambda i: (0, 0)),                 # packed conv1 b
            pl.BlockSpec((3, K2PAD * C, C), lambda i: (0, 0, 0)),   # packed conv2 w
            pl.BlockSpec((3, C), lambda i: (0, 0)),                 # packed conv2 b
            pl.BlockSpec((F, Hcat), lambda i: (0, 0)),              # [adapter|reg1] w
            pl.BlockSpec((1, Hcat), lambda i: (0, 0)),              # [adapter|reg1] b
            pl.BlockSpec((hidden, 1), lambda i: (0, 0)),            # reg2 w
            pl.BlockSpec((1, 1), lambda i: (0, 0)),                 # reg2 b
        ],
        out_specs=(
            pl.BlockSpec((Bb, F), lambda i: (i, 0)),
            pl.BlockSpec((Bb, HINT_DIM), lambda i: (i, 0)),
            pl.BlockSpec((Bb, 1), lambda i: (i, 0)),
        ),
        scratch_shapes=[pltpu.VMEM((L + 2, C), jnp.float32),
                        pltpu.VMEM((lout1 + 2, C), jnp.float32)],
        compiler_params=pltpu.CompilerParams(
            dimension_semantics=("parallel",)),
    )(x_blc, w1s, b1s, w2s, b2s, wcat, bcat, w2h, b2h)

    predictions = jnp.squeeze(pred)            # torch .squeeze()
    return predictions, features, hint


# ---------------------------------------------------------------------------
# Deterministic parameter init (PyTorch-style shapes)
# ---------------------------------------------------------------------------

def init_params(key, input_dim=14, hidden_dim=32):
    keys = iter(jax.random.split(key, 18))

    def uni(shape, fan_in):
        bound = 1.0 / float(fan_in) ** 0.5
        return jax.random.uniform(next(keys), shape, jnp.float32, -bound, bound)

    p = {}
    conv_k = {1: (5, 3), 2: (5, 5), 3: (5, 7)}
    for e in (1, 2, 3):
        for j, kk in zip((1, 2), conv_k[e]):
            fan_in = input_dim * kk
            p[f"enc{e}_w{j}"] = uni((input_dim, input_dim, kk), fan_in)  # (Cout,Cin,K)
            p[f"enc{e}_b{j}"] = uni((input_dim,), fan_in)
    p["adapter_w"] = uni((64, 42), 42)
    p["adapter_b"] = uni((64,), 42)
    p["reg_w1"] = uni((hidden_dim, 42), 42)
    p["reg_b1"] = uni((hidden_dim,), 42)
    p["reg_w2"] = uni((1, hidden_dim), hidden_dim)
    p["reg_b2"] = uni((1,), hidden_dim)
    return p


# ---------------------------------------------------------------------------
# Pure-JAX reference (sanity check)
# ---------------------------------------------------------------------------

def reference_forward(x, p):
    def conv(h, w, b, stride, pad, dil):
        y = jax.lax.conv_general_dilated(
            h, w, window_strides=(stride,), padding=[(pad, pad)],
            rhs_dilation=(dil,), dimension_numbers=("NCH", "OIH", "NCH"))
        return y + b[None, :, None]

    def maxpool(h, k):
        B, C, L = h.shape
        n = L // k
        return jnp.max(h[:, :, :n * k].reshape(B, C, n, k), axis=-1)

    def enc(e, cfg2, pk):
        h = _leaky_relu(conv(x, p[f"enc{e}_w1"], p[f"enc{e}_b1"], 2, 1, 1))
        s2, pad2, d2 = cfg2
        h = _leaky_relu(conv(h, p[f"enc{e}_w2"], p[f"enc{e}_b2"], s2, pad2, d2))
        return maxpool(h, pk)

    f1 = enc(1, (2, 1, 4), 4)
    f2 = enc(2, (2, 1, 2), 4)
    f3 = enc(3, (2, 1, 1), 5)
    B = x.shape[0]
    feats = jnp.concatenate([f1, f2, f3], axis=2).reshape(B, -1)
    hint = feats @ p["adapter_w"].T + p["adapter_b"]
    h = _leaky_relu(feats @ p["reg_w1"].T + p["reg_b1"])
    pred = h @ p["reg_w2"].T + p["reg_b2"]
    return jnp.squeeze(pred), feats, hint


if __name__ == "__main__":
    root = jax.random.PRNGKey(0)
    kx, kp = jax.random.split(root)
    B, C, L = 2, 14, 30          # input_dim=14, window=30 -> 14*3 = 42 features
    hidden_dim = 32
    x = jax.random.normal(kx, (B, C, L), jnp.float32)
    params = init_params(kp, input_dim=C, hidden_dim=hidden_dim)

    pred, feats, hint = jax.jit(cnn_rul_forward)(x, params)
    jax.block_until_ready((pred, feats, hint))

    r_pred, r_feats, r_hint = reference_forward(x, params)
    assert pred.shape == (B,) and feats.shape == (B, 42) and hint.shape == (B, 64)
    assert jnp.allclose(feats, r_feats, atol=1e-4, rtol=1e-4), "features mismatch"
    assert jnp.allclose(hint, r_hint, atol=1e-4, rtol=1e-4), "hint mismatch"
    assert jnp.allclose(pred, r_pred, atol=1e-4, rtol=1e-4), "pred mismatch"
    print("KERNEL_OK")
</pallas_src>

<mosaic_0001>
module attributes {stable_mosaic.version = 11 : i64} {
  func.func @kernel(%arg0: i32, %arg1: memref<2x30x14xf32, #tpu.memory_space<vmem>>, %arg2: memref<3x70x14xf32, #tpu.memory_space<vmem>>, %arg3: memref<3x14xf32, #tpu.memory_space<vmem>>, %arg4: memref<3x98x14xf32, #tpu.memory_space<vmem>>, %arg5: memref<3x14xf32, #tpu.memory_space<vmem>>, %arg6: memref<42x96xf32, #tpu.memory_space<vmem>>, %arg7: memref<1x96xf32, #tpu.memory_space<vmem>>, %arg8: memref<32x1xf32, #tpu.memory_space<vmem>>, %arg9: memref<1x1xf32, #tpu.memory_space<vmem>>, %arg10: memref<2x42xf32, #tpu.memory_space<vmem>>, %arg11: memref<2x64xf32, #tpu.memory_space<vmem>>, %arg12: memref<2x1xf32, #tpu.memory_space<vmem>>, %arg13: memref<32x14xf32, #tpu.memory_space<vmem>>, %arg14: memref<16x14xf32, #tpu.memory_space<vmem>>) attributes {dimension_semantics = [#tpu.dimension_semantics<parallel>], iteration_bounds = array<i64: 1>, scalar_prefetch = 0 : i64, scratch_operands = 2 : i64, tpu.core_type = #tpu.core_type<tc>, window_params = [{transform_indices = @transform_0, window_bounds = array<i64: 2, 30, 14>}, {pipeline_mode = #tpu.pipeline_mode<synchronous>, transform_indices = @transform_1, window_bounds = array<i64: 3, 70, 14>}, {pipeline_mode = #tpu.pipeline_mode<synchronous>, transform_indices = @transform_2, window_bounds = array<i64: 3, 14>}, {pipeline_mode = #tpu.pipeline_mode<synchronous>, transform_indices = @transform_3, window_bounds = array<i64: 3, 98, 14>}, {pipeline_mode = #tpu.pipeline_mode<synchronous>, transform_indices = @transform_4, window_bounds = array<i64: 3, 14>}, {pipeline_mode = #tpu.pipeline_mode<synchronous>, transform_indices = @transform_5, window_bounds = array<i64: 42, 96>}, {pipeline_mode = #tpu.pipeline_mode<synchronous>, transform_indices = @transform_6, window_bounds = array<i64: 1, 96>}, {pipeline_mode = #tpu.pipeline_mode<synchronous>, transform_indices = @transform_7, window_bounds = array<i64: 32, 1>}, {pipeline_mode = #tpu.pipeline_mode<synchronous>, transform_indices = @transform_8, window_bounds = array<i64: 1, 1>}, {transform_indices = @transform_9, window_bounds = array<i64: 2, 42>}, {transform_indices = @transform_10, window_bounds = array<i64: 2, 64>}, {transform_indices = @transform_11, window_bounds = array<i64: 2, 1>}]} {
    %cst = arith.constant 0.000000e+00 : f32
    %0 = vector.broadcast %cst : f32 to vector<1x14xf32>
    %c0 = arith.constant 0 : index
    %c0_0 = arith.constant 0 : index
    %1 = vector.load %arg13[%c0, %c0_0] : memref<32x14xf32, #tpu.memory_space<vmem>>, vector<1x14xf32>
    tpu.vector_store %arg13[%c0, %c0_0], %0 {strides = array<i32>} : memref<32x14xf32, #tpu.memory_space<vmem>>, vector<1x14xf32>,
    %c31 = arith.constant 31 : index
    %c0_1 = arith.constant 0 : index
    %2 = vector.load %arg13[%c31, %c0_1] : memref<32x14xf32, #tpu.memory_space<vmem>>, vector<1x14xf32>
    tpu.vector_store %arg13[%c31, %c0_1], %0 {strides = array<i32>} : memref<32x14xf32, #tpu.memory_space<vmem>>, vector<1x14xf32>,
    %c0_2 = arith.constant 0 : index
    %c0_3 = arith.constant 0 : index
    %3 = vector.load %arg14[%c0_2, %c0_3] : memref<16x14xf32, #tpu.memory_space<vmem>>, vector<1x14xf32>
    tpu.vector_store %arg14[%c0_2, %c0_3], %0 {strides = array<i32>} : memref<16x14xf32, #tpu.memory_space<vmem>>, vector<1x14xf32>,
    %c15 = arith.constant 15 : index
    %c0_4 = arith.constant 0 : index
    %4 = vector.load %arg14[%c15, %c0_4] : memref<16x14xf32, #tpu.memory_space<vmem>>, vector<1x14xf32>
    tpu.vector_store %arg14[%c15, %c0_4], %0 {strides = array<i32>} : memref<16x14xf32, #tpu.memory_space<vmem>>, vector<1x14xf32>,
    %c0_5 = arith.constant 0 : index
    %c0_6 = arith.constant 0 : index
    %c0_7 = arith.constant 0 : index
    %5 = vector.load %arg2[%c0_5, %c0_6, %c0_7] : memref<3x70x14xf32, #tpu.memory_space<vmem>>, vector<1x70x14xf32>
    %6 = vector.shape_cast %5 : vector<1x70x14xf32> to vector<70x14xf32>
    %c1 = arith.constant 1 : index
    %c0_8 = arith.constant 0 : index
    %c0_9 = arith.constant 0 : index
    %7 = vector.load %arg2[%c1, %c0_8, %c0_9] : memref<3x70x14xf32, #tpu.memory_space<vmem>>, vector<1x70x14xf32>
    %8 = vector.shape_cast %7 : vector<1x70x14xf32> to vector<70x14xf32>
    %c2 = arith.constant 2 : index
    %c0_10 = arith.constant 0 : index
    %c0_11 = arith.constant 0 : index
    %9 = vector.load %arg2[%c2, %c0_10, %c0_11] : memref<3x70x14xf32, #tpu.memory_space<vmem>>, vector<1x70x14xf32>
    %10 = vector.shape_cast %9 : vector<1x70x14xf32> to vector<70x14xf32>
    %c0_12 = arith.constant 0 : index
    %c0_13 = arith.constant 0 : index
    %11 = vector.load %arg3[%c0_12, %c0_13] : memref<3x14xf32, #tpu.memory_space<vmem>>, vector<1x14xf32>
    %c1_14 = arith.constant 1 : index
    %c0_15 = arith.constant 0 : index
    %12 = vector.load %arg3[%c1_14, %c0_15] : memref<3x14xf32, #tpu.memory_space<vmem>>, vector<1x14xf32>
    %c2_16 = arith.constant 2 : index
    %c0_17 = arith.constant 0 : index
    %13 = vector.load %arg3[%c2_16, %c0_17] : memref<3x14xf32, #tpu.memory_space<vmem>>, vector<1x14xf32>
    %c0_18 = arith.constant 0 : index
    %c0_19 = arith.constant 0 : index
    %c0_20 = arith.constant 0 : index
    %14 = vector.load %arg4[%c0_18, %c0_19, %c0_20] : memref<3x98x14xf32, #tpu.memory_space<vmem>>, vector<1x98x14xf32>
    %15 = vector.shape_cast %14 : vector<1x98x14xf32> to vector<98x14xf32>
    %16 = vector.extract_strided_slice %15 {offsets = [0, 0], sizes = [42, 14], strides = [1, 1]} : vector<98x14xf32> to vector<42x14xf32>
    %c1_21 = arith.constant 1 : index
    %c0_22 = arith.constant 0 : index
    %c0_23 = arith.constant 0 : index
    %17 = vector.load %arg4[%c1_21, %c0_22, %c0_23] : memref<3x98x14xf32, #tpu.memory_space<vmem>>, vector<1x98x14xf32>
    %18 = vector.shape_cast %17 : vector<1x98x14xf32> to vector<98x14xf32>
    %19 = vector.extract_strided_slice %18 {offsets = [0, 0], sizes = [70, 14], strides = [1, 1]} : vector<98x14xf32> to vector<70x14xf32>
    %c2_24 = arith.constant 2 : index
    %c0_25 = arith.constant 0 : index
    %c0_26 = arith.constant 0 : index
    %20 = vector.load %arg4[%c2_24, %c0_25, %c0_26] : memref<3x98x14xf32, #tpu.memory_space<vmem>>, vector<1x98x14xf32>
    %21 = vector.shape_cast %20 : vector<1x98x14xf32> to vector<98x14xf32>
    %c0_27 = arith.constant 0 : index
    %c0_28 = arith.constant 0 : index
    %22 = vector.load %arg5[%c0_27, %c0_28] : memref<3x14xf32, #tpu.memory_space<vmem>>, vector<1x14xf32>
    %c1_29 = arith.constant 1 : index
    %c0_30 = arith.constant 0 : index
    %23 = vector.load %arg5[%c1_29, %c0_30] : memref<3x14xf32, #tpu.memory_space<vmem>>, vector<1x14xf32>
    %c2_31 = arith.constant 2 : index
    %c0_32 = arith.constant 0 : index
    %24 = vector.load %arg5[%c2_31, %c0_32] : memref<3x14xf32, #tpu.memory_space<vmem>>, vector<1x14xf32>
    %c0_33 = arith.constant 0 : index
    %c0_34 = arith.constant 0 : index
    %c0_35 = arith.constant 0 : index
    %25 = vector.load %arg1[%c0_33, %c0_34, %c0_35] : memref<2x30x14xf32, #tpu.memory_space<vmem>>, vector<1x30x14xf32>
    %26 = vector.shape_cast %25 : vector<1x30x14xf32> to vector<30x14xf32>
    %c1_36 = arith.constant 1 : index
    %c0_37 = arith.constant 0 : index
    %27 = vector.load %arg13[%c1_36, %c0_37] : memref<32x14xf32, #tpu.memory_space<vmem>>, vector<30x14xf32>
    tpu.vector_store %arg13[%c1_36, %c0_37], %26 {strides = array<i32>} : memref<32x14xf32, #tpu.memory_space<vmem>>, vector<30x14xf32>,
    %c0_38 = arith.constant 0 : index
    %c0_39 = arith.constant 0 : index
    %28 = tpu.strided_load %arg13[%c0_38, %c0_39] {strides = array<i32: 2, 1>} : memref<32x14xf32, #tpu.memory_space<vmem>>, vector<14x14xf32>
    %c1_40 = arith.constant 1 : index
    %c0_41 = arith.constant 0 : index
    %29 = tpu.strided_load %arg13[%c1_40, %c0_41] {strides = array<i32: 2, 1>} : memref<32x14xf32, #tpu.memory_space<vmem>>, vector<14x14xf32>
    %c2_42 = arith.constant 2 : index
    %c0_43 = arith.constant 0 : index
    %30 = tpu.strided_load %arg13[%c2_42, %c0_43] {strides = array<i32: 2, 1>} : memref<32x14xf32, #tpu.memory_space<vmem>>, vector<14x14xf32>
    %c3 = arith.constant 3 : index
    %c0_44 = arith.constant 0 : index
    %31 = tpu.strided_load %arg13[%c3, %c0_44] {strides = array<i32: 2, 1>} : memref<32x14xf32, #tpu.memory_space<vmem>>, vector<14x14xf32>
    %c4 = arith.constant 4 : index
    %c0_45 = arith.constant 0 : index
    %32 = tpu.strided_load %arg13[%c4, %c0_45] {strides = array<i32: 2, 1>} : memref<32x14xf32, #tpu.memory_space<vmem>>, vector<14x14xf32>
    %33 = tpu.concatenate %28, %29, %30, %31, %32 in 1 : vector<14x14xf32>, vector<14x14xf32>, vector<14x14xf32>, vector<14x14xf32>, vector<14x14xf32> -> vector<14x70xf32>
    %cst_46 = arith.constant dense<0.000000e+00> : vector<14x14xf32>
    %34 = tpu.matmul %33, %6, %cst_46 {dimension_numbers = #tpu.dot_dimension_numbers<[1], [0], [0], [1], [0, 0, 1, 1], [], []>} : vector<14x70xf32>, vector<70x14xf32>, vector<14x14xf32> -> vector<14x14xf32>
    %35 = vector.broadcast %11 : vector<1x14xf32> to vector<14x14xf32>
    %36 = arith.addf %34, %35 : vector<14x14xf32>
    %cst_47 = arith.constant 0.000000e+00 : f32
    %37 = vector.broadcast %cst_47 : f32 to vector<14x14xf32>
    %38 = arith.cmpf oge, %36, %37 : vector<14x14xf32>
    %cst_48 = arith.constant 0.00999999977 : f32
    %39 = vector.broadcast %cst_48 : f32 to vector<14x14xf32>
    %40 = arith.mulf %39, %36 : vector<14x14xf32>
    %41 = arith.select %38, %36, %40 : vector<14x14xi1>, vector<14x14xf32>
    %c1_49 = arith.constant 1 : index
    %c0_50 = arith.constant 0 : index
    %42 = vector.load %arg14[%c1_49, %c0_50] : memref<16x14xf32, #tpu.memory_space<vmem>>, vector<14x14xf32>
    tpu.vector_store %arg14[%c1_49, %c0_50], %41 {strides = array<i32>} : memref<16x14xf32, #tpu.memory_space<vmem>>, vector<14x14xf32>,
    %c0_51 = arith.constant 0 : index
    %c0_52 = arith.constant 0 : index
    %43 = tpu.strided_load %arg14[%c0_51, %c0_52] {strides = array<i32: 2, 1>} : memref<16x14xf32, #tpu.memory_space<vmem>>, vector<4x14xf32>
    %c4_53 = arith.constant 4 : index
    %c0_54 = arith.constant 0 : index
    %44 = tpu.strided_load %arg14[%c4_53, %c0_54] {strides = array<i32: 2, 1>} : memref<16x14xf32, #tpu.memory_space<vmem>>, vector<4x14xf32>
    %c8 = arith.constant 8 : index
    %c0_55 = arith.constant 0 : index
    %45 = tpu.strided_load %arg14[%c8, %c0_55] {strides = array<i32: 2, 1>} : memref<16x14xf32, #tpu.memory_space<vmem>>, vector<4x14xf32>
    %46 = tpu.concatenate %43, %44, %45 in 1 : vector<4x14xf32>, vector<4x14xf32>, vector<4x14xf32> -> vector<4x42xf32>
    %cst_56 = arith.constant dense<0.000000e+00> : vector<4x14xf32>
    %47 = tpu.matmul %46, %16, %cst_56 {dimension_numbers = #tpu.dot_dimension_numbers<[1], [0], [0], [1], [0, 0, 1, 1], [], []>} : vector<4x42xf32>, vector<42x14xf32>, vector<4x14xf32> -> vector<4x14xf32>
    %48 = vector.broadcast %22 : vector<1x14xf32> to vector<4x14xf32>
    %49 = arith.addf %47, %48 : vector<4x14xf32>
    %cst_57 = arith.constant 0.000000e+00 : f32
    %50 = vector.broadcast %cst_57 : f32 to vector<4x14xf32>
    %51 = arith.cmpf oge, %49, %50 : vector<4x14xf32>
    %cst_58 = arith.constant 0.00999999977 : f32
    %52 = vector.broadcast %cst_58 : f32 to vector<4x14xf32>
    %53 = arith.mulf %52, %49 : vector<4x14xf32>
    %54 = arith.select %51, %49, %53 : vector<4x14xi1>, vector<4x14xf32>
    %cst_59 = arith.constant dense<0xFF800000> : vector<14xf32>
    %55 = vector.multi_reduction <maximumf>, %54, %cst_59 [0] : vector<4x14xf32> to vector<14xf32>
    %56 = vector.shape_cast %55 : vector<14xf32> to vector<1x14xf32>
    %c0_60 = arith.constant 0 : index
    %c0_61 = arith.constant 0 : index
    %57 = tpu.strided_load %arg13[%c0_60, %c0_61] {strides = array<i32: 2, 1>} : memref<32x14xf32, #tpu.memory_space<vmem>>, vector<14x14xf32>
    %c1_62 = arith.constant 1 : index
    %c0_63 = arith.constant 0 : index
    %58 = tpu.strided_load %arg13[%c1_62, %c0_63] {strides = array<i32: 2, 1>} : memref<32x14xf32, #tpu.memory_space<vmem>>, vector<14x14xf32>
    %c2_64 = arith.constant 2 : index
    %c0_65 = arith.constant 0 : index
    %59 = tpu.strided_load %arg13[%c2_64, %c0_65] {strides = array<i32: 2, 1>} : memref<32x14xf32, #tpu.memory_space<vmem>>, vector<14x14xf32>
    %c3_66 = arith.constant 3 : index
    %c0_67 = arith.constant 0 : index
    %60 = tpu.strided_load %arg13[%c3_66, %c0_67] {strides = array<i32: 2, 1>} : memref<32x14xf32, #tpu.memory_space<vmem>>, vector<14x14xf32>
    %c4_68 = arith.constant 4 : index
    %c0_69 = arith.constant 0 : index
    %61 = tpu.strided_load %arg13[%c4_68, %c0_69] {strides = array<i32: 2, 1>} : memref<32x14xf32, #tpu.memory_space<vmem>>, vector<14x14xf32>
    %62 = tpu.concatenate %57, %58, %59, %60, %61 in 1 : vector<14x14xf32>, vector<14x14xf32>, vector<14x14xf32>, vector<14x14xf32>, vector<14x14xf32> -> vector<14x70xf32>
    %cst_70 = arith.constant dense<0.000000e+00> : vector<14x14xf32>
    %63 = tpu.matmul %62, %8, %cst_70 {dimension_numbers = #tpu.dot_dimension_numbers<[1], [0], [0], [1], [0, 0, 1, 1], [], []>} : vector<14x70xf32>, vector<70x14xf32>, vector<14x14xf32> -> vector<14x14xf32>
    %64 = vector.broadcast %12 : vector<1x14xf32> to vector<14x14xf32>
    %65 = arith.addf %63, %64 : vector<14x14xf32>
    %cst_71 = arith.constant 0.000000e+00 : f32
    %66 = vector.broadcast %cst_71 : f32 to vector<14x14xf32>
    %67 = arith.cmpf oge, %65, %66 : vector<14x14xf32>
    %cst_72 = arith.constant 0.00999999977 : f32
    %68 = vector.broadcast %cst_72 : f32 to vector<14x14xf32>
    %69 = arith.mulf %68, %65 : vector<14x14xf32>
    %70 = arith.select %67, %65, %69 : vector<14x14xi1>, vector<14x14xf32>
    %c1_73 = arith.constant 1 : index
    %c0_74 = arith.constant 0 : index
    %71 = vector.load %arg14[%c1_73, %c0_74] : memref<16x14xf32, #tpu.memory_space<vmem>>, vector<14x14xf32>
    tpu.vector_store %arg14[%c1_73, %c0_74], %70 {strides = array<i32>} : memref<16x14xf32, #tpu.memory_space<vmem>>, vector<14x14xf32>,
    %c0_75 = arith.constant 0 : index
    %c0_76 = arith.constant 0 : index
    %72 = tpu.strided_load %arg14[%c0_75, %c0_76] {strides = array<i32: 2, 1>} : memref<16x14xf32, #tpu.memory_space<vmem>>, vector<4x14xf32>
    %c2_77 = arith.constant 2 : index
    %c0_78 = arith.constant 0 : index
    %73 = tpu.strided_load %arg14[%c2_77, %c0_78] {strides = array<i32: 2, 1>} : memref<16x14xf32, #tpu.memory_space<vmem>>, vector<4x14xf32>
    %c4_79 = arith.constant 4 : index
    %c0_80 = arith.constant 0 : index
    %74 = tpu.strided_load %arg14[%c4_79, %c0_80] {strides = array<i32: 2, 1>} : memref<16x14xf32, #tpu.memory_space<vmem>>, vector<4x14xf32>
    %c6 = arith.constant 6 : index
    %c0_81 = arith.constant 0 : index
    %75 = tpu.strided_load %arg14[%c6, %c0_81] {strides = array<i32: 2, 1>} : memref<16x14xf32, #tpu.memory_space<vmem>>, vector<4x14xf32>
    %c8_82 = arith.constant 8 : index
    %c0_83 = arith.constant 0 : index
    %76 = tpu.strided_load %arg14[%c8_82, %c0_83] {strides = array<i32: 2, 1>} : memref<16x14xf32, #tpu.memory_space<vmem>>, vector<4x14xf32>
    %77 = tpu.concatenate %72, %73, %74, %75, %76 in 1 : vector<4x14xf32>, vector<4x14xf32>, vector<4x14xf32>, vector<4x14xf32>, vector<4x14xf32> -> vector<4x70xf32>
    %cst_84 = arith.constant dense<0.000000e+00> : vector<4x14xf32>
    %78 = tpu.matmul %77, %19, %cst_84 {dimension_numbers = #tpu.dot_dimension_numbers<[1], [0], [0], [1], [0, 0, 1, 1], [], []>} : vector<4x70xf32>, vector<70x14xf32>, vector<4x14xf32> -> vector<4x14xf32>
    %79 = vector.broadcast %23 : vector<1x14xf32> to vector<4x14xf32>
    %80 = arith.addf %78, %79 : vector<4x14xf32>
    %cst_85 = arith.constant 0.000000e+00 : f32
    %81 = vector.broadcast %cst_85 : f32 to vector<4x14xf32>
    %82 = arith.cmpf oge, %80, %81 : vector<4x14xf32>
    %cst_86 = arith.constant 0.00999999977 : f32
    %83 = vector.broadcast %cst_86 : f32 to vector<4x14xf32>
    %84 = arith.mulf %83, %80 : vector<4x14xf32>
    %85 = arith.select %82, %80, %84 : vector<4x14xi1>, vector<4x14xf32>
    %cst_87 = arith.constant dense<0xFF800000> : vector<14xf32>
    %86 = vector.multi_reduction <maximumf>, %85, %cst_87 [0] : vector<4x14xf32> to vector<14xf32>
    %87 = vector.shape_cast %86 : vector<14xf32> to vector<1x14xf32>
    %c0_88 = arith.constant 0 : index
    %c0_89 = arith.constant 0 : index
    %88 = tpu.strided_load %arg13[%c0_88, %c0_89] {strides = array<i32: 2, 1>} : memref<32x14xf32, #tpu.memory_space<vmem>>, vector<14x14xf32>
    %c1_90 = arith.constant 1 : index
    %c0_91 = arith.constant 0 : index
    %89 = tpu.strided_load %arg13[%c1_90, %c0_91] {strides = array<i32: 2, 1>} : memref<32x14xf32, #tpu.memory_space<vmem>>, vector<14x14xf32>
    %c2_92 = arith.constant 2 : index
    %c0_93 = arith.constant 0 : index
    %90 = tpu.strided_load %arg13[%c2_92, %c0_93] {strides = array<i32: 2, 1>} : memref<32x14xf32, #tpu.memory_space<vmem>>, vector<14x14xf32>
    %c3_94 = arith.constant 3 : index
    %c0_95 = arith.constant 0 : index
    %91 = tpu.strided_load %arg13[%c3_94, %c0_95] {strides = array<i32: 2, 1>} : memref<32x14xf32, #tpu.memory_space<vmem>>, vector<14x14xf32>
    %c4_96 = arith.constant 4 : index
    %c0_97 = arith.constant 0 : index
    %92 = tpu.strided_load %arg13[%c4_96, %c0_97] {strides = array<i32: 2, 1>} : memref<32x14xf32, #tpu.memory_space<vmem>>, vector<14x14xf32>
    %93 = tpu.concatenate %88, %89, %90, %91, %92 in 1 : vector<14x14xf32>, vector<14x14xf32>, vector<14x14xf32>, vector<14x14xf32>, vector<14x14xf32> -> vector<14x70xf32>
    %cst_98 = arith.constant dense<0.000000e+00> : vector<14x14xf32>
    %94 = tpu.matmul %93, %10, %cst_98 {dimension_numbers = #tpu.dot_dimension_numbers<[1], [0], [0], [1], [0, 0, 1, 1], [], []>} : vector<14x70xf32>, vector<70x14xf32>, vector<14x14xf32> -> vector<14x14xf32>
    %95 = vector.broadcast %13 : vector<1x14xf32> to vector<14x14xf32>
    %96 = arith.addf %94, %95 : vector<14x14xf32>
    %cst_99 = arith.constant 0.000000e+00 : f32
    %97 = vector.broadcast %cst_99 : f32 to vector<14x14xf32>
    %98 = arith.cmpf oge, %96, %97 : vector<14x14xf32>
    %cst_100 = arith.constant 0.00999999977 : f32
    %99 = vector.broadcast %cst_100 : f32 to vector<14x14xf32>
    %100 = arith.mulf %99, %96 : vector<14x14xf32>
    %101 = arith.select %98, %96, %100 : vector<14x14xi1>, vector<14x14xf32>
    %c1_101 = arith.constant 1 : index
    %c0_102 = arith.constant 0 : index
    %102 = vector.load %arg14[%c1_101, %c0_102] : memref<16x14xf32, #tpu.memory_space<vmem>>, vector<14x14xf32>
    tpu.vector_store %arg14[%c1_101, %c0_102], %101 {strides = array<i32>} : memref<16x14xf32, #tpu.memory_space<vmem>>, vector<14x14xf32>,
    %c0_103 = arith.constant 0 : index
    %c0_104 = arith.constant 0 : index
    %103 = tpu.strided_load %arg14[%c0_103, %c0_104] {strides = array<i32: 2, 1>} : memref<16x14xf32, #tpu.memory_space<vmem>>, vector<5x14xf32>
    %c1_105 = arith.constant 1 : index
    %c0_106 = arith.constant 0 : index
    %104 = tpu.strided_load %arg14[%c1_105, %c0_106] {strides = array<i32: 2, 1>} : memref<16x14xf32, #tpu.memory_space<vmem>>, vector<5x14xf32>
    %c2_107 = arith.constant 2 : index
    %c0_108 = arith.constant 0 : index
    %105 = tpu.strided_load %arg14[%c2_107, %c0_108] {strides = array<i32: 2, 1>} : memref<16x14xf32, #tpu.memory_space<vmem>>, vector<5x14xf32>
    %c3_109 = arith.constant 3 : index
    %c0_110 = arith.constant 0 : index
    %106 = tpu.strided_load %arg14[%c3_109, %c0_110] {strides = array<i32: 2, 1>} : memref<16x14xf32, #tpu.memory_space<vmem>>, vector<5x14xf32>
    %c4_111 = arith.constant 4 : index
    %c0_112 = arith.constant 0 : index
    %107 = tpu.strided_load %arg14[%c4_111, %c0_112] {strides = array<i32: 2, 1>} : memref<16x14xf32, #tpu.memory_space<vmem>>, vector<5x14xf32>
    %c5 = arith.constant 5 : index
    %c0_113 = arith.constant 0 : index
    %108 = tpu.strided_load %arg14[%c5, %c0_113] {strides = array<i32: 2, 1>} : memref<16x14xf32, #tpu.memory_space<vmem>>, vector<5x14xf32>
    %c6_114 = arith.constant 6 : index
    %c0_115 = arith.constant 0 : index
    %109 = tpu.strided_load %arg14[%c6_114, %c0_115] {strides = array<i32: 2, 1>} : memref<16x14xf32, #tpu.memory_space<vmem>>, vector<5x14xf32>
    %110 = tpu.concatenate %103, %104, %105, %106, %107, %108, %109 in 1 : vector<5x14xf32>, vector<5x14xf32>, vector<5x14xf32>, vector<5x14xf32>, vector<5x14xf32>, vector<5x14xf32>, vector<5x14xf32> -> vector<5x98xf32>
    %cst_116 = arith.constant dense<0.000000e+00> : vector<5x14xf32>
    %111 = tpu.matmul %110, %21, %cst_116 {dimension_numbers = #tpu.dot_dimension_numbers<[1], [0], [0], [1], [0, 0, 1, 1], [], []>} : vector<5x98xf32>, vector<98x14xf32>, vector<5x14xf32> -> vector<5x14xf32>
    %112 = vector.broadcast %24 : vector<1x14xf32> to vector<5x14xf32>
    %113 = arith.addf %111, %112 : vector<5x14xf32>
    %cst_117 = arith.constant 0.000000e+00 : f32
    %114 = vector.broadcast %cst_117 : f32 to vector<5x14xf32>
    %115 = arith.cmpf oge, %113, %114 : vector<5x14xf32>
    %cst_118 = arith.constant 0.00999999977 : f32
    %116 = vector.broadcast %cst_118 : f32 to vector<5x14xf32>
    %117 = arith.mulf %116, %113 : vector<5x14xf32>
    %118 = arith.select %115, %113, %117 : vector<5x14xi1>, vector<5x14xf32>
    %cst_119 = arith.constant dense<0xFF800000> : vector<14xf32>
    %119 = vector.multi_reduction <maximumf>, %118, %cst_119 [0] : vector<5x14xf32> to vector<14xf32>
    %120 = vector.shape_cast %119 : vector<14xf32> to vector<1x14xf32>
    %121 = tpu.concatenate %56, %87, %120 in 1 : vector<1x14xf32>, vector<1x14xf32>, vector<1x14xf32> -> vector<1x42xf32>
    %c1_120 = arith.constant 1 : index
    %c0_121 = arith.constant 0 : index
    %c0_122 = arith.constant 0 : index
    %122 = vector.load %arg1[%c1_120, %c0_121, %c0_122] : memref<2x30x14xf32, #tpu.memory_space<vmem>>, vector<1x30x14xf32>
    %123 = vector.shape_cast %122 : vector<1x30x14xf32> to vector<30x14xf32>
    %c1_123 = arith.constant 1 : index
    %c0_124 = arith.constant 0 : index
    %124 = vector.load %arg13[%c1_123, %c0_124] : memref<32x14xf32, #tpu.memory_space<vmem>>, vector<30x14xf32>
    tpu.vector_store %arg13[%c1_123, %c0_124], %123 {strides = array<i32>} : memref<32x14xf32, #tpu.memory_space<vmem>>, vector<30x14xf32>,
    %c0_125 = arith.constant 0 : index
    %c0_126 = arith.constant 0 : index
    %125 = tpu.strided_load %arg13[%c0_125, %c0_126] {strides = array<i32: 2, 1>} : memref<32x14xf32, #tpu.memory_space<vmem>>, vector<14x14xf32>
    %c1_127 = arith.constant 1 : index
    %c0_128 = arith.constant 0 : index
    %126 = tpu.strided_load %arg13[%c1_127, %c0_128] {strides = array<i32: 2, 1>} : memref<32x14xf32, #tpu.memory_space<vmem>>, vector<14x14xf32>
    %c2_129 = arith.constant 2 : index
    %c0_130 = arith.constant 0 : index
    %127 = tpu.strided_load %arg13[%c2_129, %c0_130] {strides = array<i32: 2, 1>} : memref<32x14xf32, #tpu.memory_space<vmem>>, vector<14x14xf32>
    %c3_131 = arith.constant 3 : index
    %c0_132 = arith.constant 0 : index
    %128 = tpu.strided_load %arg13[%c3_131, %c0_132] {strides = array<i32: 2, 1>} : memref<32x14xf32, #tpu.memory_space<vmem>>, vector<14x14xf32>
    %c4_133 = arith.constant 4 : index
    %c0_134 = arith.constant 0 : index
    %129 = tpu.strided_load %arg13[%c4_133, %c0_134] {strides = array<i32: 2, 1>} : memref<32x14xf32, #tpu.memory_space<vmem>>, vector<14x14xf32>
    %130 = tpu.concatenate %125, %126, %127, %128, %129 in 1 : vector<14x14xf32>, vector<14x14xf32>, vector<14x14xf32>, vector<14x14xf32>, vector<14x14xf32> -> vector<14x70xf32>
    %cst_135 = arith.constant dense<0.000000e+00> : vector<14x14xf32>
    %131 = tpu.matmul %130, %6, %cst_135 {dimension_numbers = #tpu.dot_dimension_numbers<[1], [0], [0], [1], [0, 0, 1, 1], [], []>} : vector<14x70xf32>, vector<70x14xf32>, vector<14x14xf32> -> vector<14x14xf32>
    %132 = vector.broadcast %11 : vector<1x14xf32> to vector<14x14xf32>
    %133 = arith.addf %131, %132 : vector<14x14xf32>
    %cst_136 = arith.constant 0.000000e+00 : f32
    %134 = vector.broadcast %cst_136 : f32 to vector<14x14xf32>
    %135 = arith.cmpf oge, %133, %134 : vector<14x14xf32>
    %cst_137 = arith.constant 0.00999999977 : f32
    %136 = vector.broadcast %cst_137 : f32 to vector<14x14xf32>
    %137 = arith.mulf %136, %133 : vector<14x14xf32>
    %138 = arith.select %135, %133, %137 : vector<14x14xi1>, vector<14x14xf32>
    %c1_138 = arith.constant 1 : index
    %c0_139 = arith.constant 0 : index
    %139 = vector.load %arg14[%c1_138, %c0_139] : memref<16x14xf32, #tpu.memory_space<vmem>>, vector<14x14xf32>
    tpu.vector_store %arg14[%c1_138, %c0_139], %138 {strides = array<i32>} : memref<16x14xf32, #tpu.memory_space<vmem>>, vector<14x14xf32>,
    %c0_140 = arith.constant 0 : index
    %c0_141 = arith.constant 0 : index
    %140 = tpu.strided_load %arg14[%c0_140, %c0_141] {strides = array<i32: 2, 1>} : memref<16x14xf32, #tpu.memory_space<vmem>>, vector<4x14xf32>
    %c4_142 = arith.constant 4 : index
    %c0_143 = arith.constant 0 : index
    %141 = tpu.strided_load %arg14[%c4_142, %c0_143] {strides = array<i32: 2, 1>} : memref<16x14xf32, #tpu.memory_space<vmem>>, vector<4x14xf32>
    %c8_144 = arith.constant 8 : index
    %c0_145 = arith.constant 0 : index
    %142 = tpu.strided_load %arg14[%c8_144, %c0_145] {strides = array<i32: 2, 1>} : memref<16x14xf32, #tpu.memory_space<vmem>>, vector<4x14xf32>
    %143 = tpu.concatenate %140, %141, %142 in 1 : vector<4x14xf32>, vector<4x14xf32>, vector<4x14xf32> -> vector<4x42xf32>
    %cst_146 = arith.constant dense<0.000000e+00> : vector<4x14xf32>
    %144 = tpu.matmul %143, %16, %cst_146 {dimension_numbers = #tpu.dot_dimension_numbers<[1], [0], [0], [1], [0, 0, 1, 1], [], []>} : vector<4x42xf32>, vector<42x14xf32>, vector<4x14xf32> -> vector<4x14xf32>
    %145 = vector.broadcast %22 : vector<1x14xf32> to vector<4x14xf32>
    %146 = arith.addf %144, %145 : vector<4x14xf32>
    %cst_147 = arith.constant 0.000000e+00 : f32
    %147 = vector.broadcast %cst_147 : f32 to vector<4x14xf32>
    %148 = arith.cmpf oge, %146, %147 : vector<4x14xf32>
    %cst_148 = arith.constant 0.00999999977 : f32
    %149 = vector.broadcast %cst_148 : f32 to vector<4x14xf32>
    %150 = arith.mulf %149, %146 : vector<4x14xf32>
    %151 = arith.select %148, %146, %150 : vector<4x14xi1>, vector<4x14xf32>
    %cst_149 = arith.constant dense<0xFF800000> : vector<14xf32>
    %152 = vector.multi_reduction <maximumf>, %151, %cst_149 [0] : vector<4x14xf32> to vector<14xf32>
    %153 = vector.shape_cast %152 : vector<14xf32> to vector<1x14xf32>
    %c0_150 = arith.constant 0 : index
    %c0_151 = arith.constant 0 : index
    %154 = tpu.strided_load %arg13[%c0_150, %c0_151] {strides = array<i32: 2, 1>} : memref<32x14xf32, #tpu.memory_space<vmem>>, vector<14x14xf32>
    %c1_152 = arith.constant 1 : index
    %c0_153 = arith.constant 0 : index
    %155 = tpu.strided_load %arg13[%c1_152, %c0_153] {strides = array<i32: 2, 1>} : memref<32x14xf32, #tpu.memory_space<vmem>>, vector<14x14xf32>
    %c2_154 = arith.constant 2 : index
    %c0_155 = arith.constant 0 : index
    %156 = tpu.strided_load %arg13[%c2_154, %c0_155] {strides = array<i32: 2, 1>} : memref<32x14xf32, #tpu.memory_space<vmem>>, vector<14x14xf32>
    %c3_156 = arith.constant 3 : index
    %c0_157 = arith.constant 0 : index
    %157 = tpu.strided_load %arg13[%c3_156, %c0_157] {strides = array<i32: 2, 1>} : memref<32x14xf32, #tpu.memory_space<vmem>>, vector<14x14xf32>
    %c4_158 = arith.constant 4 : index
    %c0_159 = arith.constant 0 : index
    %158 = tpu.strided_load %arg13[%c4_158, %c0_159] {strides = array<i32: 2, 1>} : memref<32x14xf32, #tpu.memory_space<vmem>>, vector<14x14xf32>
    %159 = tpu.concatenate %154, %155, %156, %157, %158 in 1 : vector<14x14xf32>, vector<14x14xf32>, vector<14x14xf32>, vector<14x14xf32>, vector<14x14xf32> -> vector<14x70xf32>
    %cst_160 = arith.constant dense<0.000000e+00> : vector<14x14xf32>
    %160 = tpu.matmul %159, %8, %cst_160 {dimension_numbers = #tpu.dot_dimension_numbers<[1], [0], [0], [1], [0, 0, 1, 1], [], []>} : vector<14x70xf32>, vector<70x14xf32>, vector<14x14xf32> -> vector<14x14xf32>
    %161 = vector.broadcast %12 : vector<1x14xf32> to vector<14x14xf32>
    %162 = arith.addf %160, %161 : vector<14x14xf32>
    %cst_161 = arith.constant 0.000000e+00 : f32
    %163 = vector.broadcast %cst_161 : f32 to vector<14x14xf32>
    %164 = arith.cmpf oge, %162, %163 : vector<14x14xf32>
    %cst_162 = arith.constant 0.00999999977 : f32
    %165 = vector.broadcast %cst_162 : f32 to vector<14x14xf32>
    %166 = arith.mulf %165, %162 : vector<14x14xf32>
    %167 = arith.select %164, %162, %166 : vector<14x14xi1>, vector<14x14xf32>
    %c1_163 = arith.constant 1 : index
    %c0_164 = arith.constant 0 : index
    %168 = vector.load %arg14[%c1_163, %c0_164] : memref<16x14xf32, #tpu.memory_space<vmem>>, vector<14x14xf32>
    tpu.vector_store %arg14[%c1_163, %c0_164], %167 {strides = array<i32>} : memref<16x14xf32, #tpu.memory_space<vmem>>, vector<14x14xf32>,
    %c0_165 = arith.constant 0 : index
    %c0_166 = arith.constant 0 : index
    %169 = tpu.strided_load %arg14[%c0_165, %c0_166] {strides = array<i32: 2, 1>} : memref<16x14xf32, #tpu.memory_space<vmem>>, vector<4x14xf32>
    %c2_167 = arith.constant 2 : index
    %c0_168 = arith.constant 0 : index
    %170 = tpu.strided_load %arg14[%c2_167, %c0_168] {strides = array<i32: 2, 1>} : memref<16x14xf32, #tpu.memory_space<vmem>>, vector<4x14xf32>
    %c4_169 = arith.constant 4 : index
    %c0_170 = arith.constant 0 : index
    %171 = tpu.strided_load %arg14[%c4_169, %c0_170] {strides = array<i32: 2, 1>} : memref<16x14xf32, #tpu.memory_space<vmem>>, vector<4x14xf32>
    %c6_171 = arith.constant 6 : index
    %c0_172 = arith.constant 0 : index
    %172 = tpu.strided_load %arg14[%c6_171, %c0_172] {strides = array<i32: 2, 1>} : memref<16x14xf32, #tpu.memory_space<vmem>>, vector<4x14xf32>
    %c8_173 = arith.constant 8 : index
    %c0_174 = arith.constant 0 : index
    %173 = tpu.strided_load %arg14[%c8_173, %c0_174] {strides = array<i32: 2, 1>} : memref<16x14xf32, #tpu.memory_space<vmem>>, vector<4x14xf32>
    %174 = tpu.concatenate %169, %170, %171, %172, %173 in 1 : vector<4x14xf32>, vector<4x14xf32>, vector<4x14xf32>, vector<4x14xf32>, vector<4x14xf32> -> vector<4x70xf32>
    %cst_175 = arith.constant dense<0.000000e+00> : vector<4x14xf32>
    %175 = tpu.matmul %174, %19, %cst_175 {dimension_numbers = #tpu.dot_dimension_numbers<[1], [0], [0], [1], [0, 0, 1, 1], [], []>} : vector<4x70xf32>, vector<70x14xf32>, vector<4x14xf32> -> vector<4x14xf32>
    %176 = vector.broadcast %23 : vector<1x14xf32> to vector<4x14xf32>
    %177 = arith.addf %175, %176 : vector<4x14xf32>
    %cst_176 = arith.constant 0.000000e+00 : f32
    %178 = vector.broadcast %cst_176 : f32 to vector<4x14xf32>
    %179 = arith.cmpf oge, %177, %178 : vector<4x14xf32>
    %cst_177 = arith.constant 0.00999999977 : f32
    %180 = vector.broadcast %cst_177 : f32 to vector<4x14xf32>
    %181 = arith.mulf %180, %177 : vector<4x14xf32>
    %182 = arith.select %179, %177, %181 : vector<4x14xi1>, vector<4x14xf32>
    %cst_178 = arith.constant dense<0xFF800000> : vector<14xf32>
    %183 = vector.multi_reduction <maximumf>, %182, %cst_178 [0] : vector<4x14xf32> to vector<14xf32>
    %184 = vector.shape_cast %183 : vector<14xf32> to vector<1x14xf32>
    %c0_179 = arith.constant 0 : index
    %c0_180 = arith.constant 0 : index
    %185 = tpu.strided_load %arg13[%c0_179, %c0_180] {strides = array<i32: 2, 1>} : memref<32x14xf32, #tpu.memory_space<vmem>>, vector<14x14xf32>
    %c1_181 = arith.constant 1 : index
    %c0_182 = arith.constant 0 : index
    %186 = tpu.strided_load %arg13[%c1_181, %c0_182] {strides = array<i32: 2, 1>} : memref<32x14xf32, #tpu.memory_space<vmem>>, vector<14x14xf32>
    %c2_183 = arith.constant 2 : index
    %c0_184 = arith.constant 0 : index
    %187 = tpu.strided_load %arg13[%c2_183, %c0_184] {strides = array<i32: 2, 1>} : memref<32x14xf32, #tpu.memory_space<vmem>>, vector<14x14xf32>
    %c3_185 = arith.constant 3 : index
    %c0_186 = arith.constant 0 : index
    %188 = tpu.strided_load %arg13[%c3_185, %c0_186] {strides = array<i32: 2, 1>} : memref<32x14xf32, #tpu.memory_space<vmem>>, vector<14x14xf32>
    %c4_187 = arith.constant 4 : index
    %c0_188 = arith.constant 0 : index
    %189 = tpu.strided_load %arg13[%c4_187, %c0_188] {strides = array<i32: 2, 1>} : memref<32x14xf32, #tpu.memory_space<vmem>>, vector<14x14xf32>
    %190 = tpu.concatenate %185, %186, %187, %188, %189 in 1 : vector<14x14xf32>, vector<14x14xf32>, vector<14x14xf32>, vector<14x14xf32>, vector<14x14xf32> -> vector<14x70xf32>
    %cst_189 = arith.constant dense<0.000000e+00> : vector<14x14xf32>
    %191 = tpu.matmul %190, %10, %cst_189 {dimension_numbers = #tpu.dot_dimension_numbers<[1], [0], [0], [1], [0, 0, 1, 1], [], []>} : vector<14x70xf32>, vector<70x14xf32>, vector<14x14xf32> -> vector<14x14xf32>
    %192 = vector.broadcast %13 : vector<1x14xf32> to vector<14x14xf32>
    %193 = arith.addf %191, %192 : vector<14x14xf32>
    %cst_190 = arith.constant 0.000000e+00 : f32
    %194 = vector.broadcast %cst_190 : f32 to vector<14x14xf32>
    %195 = arith.cmpf oge, %193, %194 : vector<14x14xf32>
    %cst_191 = arith.constant 0.00999999977 : f32
    %196 = vector.broadcast %cst_191 : f32 to vector<14x14xf32>
    %197 = arith.mulf %196, %193 : vector<14x14xf32>
    %198 = arith.select %195, %193, %197 : vector<14x14xi1>, vector<14x14xf32>
    %c1_192 = arith.constant 1 : index
    %c0_193 = arith.constant 0 : index
    %199 = vector.load %arg14[%c1_192, %c0_193] : memref<16x14xf32, #tpu.memory_space<vmem>>, vector<14x14xf32>
    tpu.vector_store %arg14[%c1_192, %c0_193], %198 {strides = array<i32>} : memref<16x14xf32, #tpu.memory_space<vmem>>, vector<14x14xf32>,
    %c0_194 = arith.constant 0 : index
    %c0_195 = arith.constant 0 : index
    %200 = tpu.strided_load %arg14[%c0_194, %c0_195] {strides = array<i32: 2, 1>} : memref<16x14xf32, #tpu.memory_space<vmem>>, vector<5x14xf32>
    %c1_196 = arith.constant 1 : index
    %c0_197 = arith.constant 0 : index
    %201 = tpu.strided_load %arg14[%c1_196, %c0_197] {strides = array<i32: 2, 1>} : memref<16x14xf32, #tpu.memory_space<vmem>>, vector<5x14xf32>
    %c2_198 = arith.constant 2 : index
    %c0_199 = arith.constant 0 : index
    %202 = tpu.strided_load %arg14[%c2_198, %c0_199] {strides = array<i32: 2, 1>} : memref<16x14xf32, #tpu.memory_space<vmem>>, vector<5x14xf32>
    %c3_200 = arith.constant 3 : index
    %c0_201 = arith.constant 0 : index
    %203 = tpu.strided_load %arg14[%c3_200, %c0_201] {strides = array<i32: 2, 1>} : memref<16x14xf32, #tpu.memory_space<vmem>>, vector<5x14xf32>
    %c4_202 = arith.constant 4 : index
    %c0_203 = arith.constant 0 : index
    %204 = tpu.strided_load %arg14[%c4_202, %c0_203] {strides = array<i32: 2, 1>} : memref<16x14xf32, #tpu.memory_space<vmem>>, vector<5x14xf32>
    %c5_204 = arith.constant 5 : index
    %c0_205 = arith.constant 0 : index
    %205 = tpu.strided_load %arg14[%c5_204, %c0_205] {strides = array<i32: 2, 1>} : memref<16x14xf32, #tpu.memory_space<vmem>>, vector<5x14xf32>
    %c6_206 = arith.constant 6 : index
    %c0_207 = arith.constant 0 : index
    %206 = tpu.strided_load %arg14[%c6_206, %c0_207] {strides = array<i32: 2, 1>} : memref<16x14xf32, #tpu.memory_space<vmem>>, vector<5x14xf32>
    %207 = tpu.concatenate %200, %201, %202, %203, %204, %205, %206 in 1 : vector<5x14xf32>, vector<5x14xf32>, vector<5x14xf32>, vector<5x14xf32>, vector<5x14xf32>, vector<5x14xf32>, vector<5x14xf32> -> vector<5x98xf32>
    %cst_208 = arith.constant dense<0.000000e+00> : vector<5x14xf32>
    %208 = tpu.matmul %207, %21, %cst_208 {dimension_numbers = #tpu.dot_dimension_numbers<[1], [0], [0], [1], [0, 0, 1, 1], [], []>} : vector<5x98xf32>, vector<98x14xf32>, vector<5x14xf32> -> vector<5x14xf32>
    %209 = vector.broadcast %24 : vector<1x14xf32> to vector<5x14xf32>
    %210 = arith.addf %208, %209 : vector<5x14xf32>
    %cst_209 = arith.constant 0.000000e+00 : f32
    %211 = vector.broadcast %cst_209 : f32 to vector<5x14xf32>
    %212 = arith.cmpf oge, %210, %211 : vector<5x14xf32>
    %cst_210 = arith.constant 0.00999999977 : f32
    %213 = vector.broadcast %cst_210 : f32 to vector<5x14xf32>
    %214 = arith.mulf %213, %210 : vector<5x14xf32>
    %215 = arith.select %212, %210, %214 : vector<5x14xi1>, vector<5x14xf32>
    %cst_211 = arith.constant dense<0xFF800000> : vector<14xf32>
    %216 = vector.multi_reduction <maximumf>, %215, %cst_211 [0] : vector<5x14xf32> to vector<14xf32>
    %217 = vector.shape_cast %216 : vector<14xf32> to vector<1x14xf32>
    %218 = tpu.concatenate %153, %184, %217 in 1 : vector<1x14xf32>, vector<1x14xf32>, vector<1x14xf32> -> vector<1x42xf32>
    %219 = tpu.concatenate %121, %218 in 0 : vector<1x42xf32>, vector<1x42xf32> -> vector<2x42xf32>
    %220 = tpu.iota {dimensions = array<i32: 0>} : vector<42x42xi32>
    %221 = tpu.iota {dimensions = array<i32: 1>} : vector<42x42xi32>
    %c14_i32 = arith.constant 14 : i32
    %222 = vector.broadcast %c14_i32 : i32 to vector<42x42xi32>
    %223 = arith.cmpi sge, %220, %222 : vector<42x42xi32>
    %224 = arith.extui %223 : vector<42x42xi1> to vector<42x42xi32>
    %c28_i32 = arith.constant 28 : i32
    %225 = vector.broadcast %c28_i32 : i32 to vector<42x42xi32>
    %226 = arith.cmpi sge, %220, %225 : vector<42x42xi32>
    %227 = arith.extui %226 : vector<42x42xi1> to vector<42x42xi32>
    %228 = arith.addi %224, %227 : vector<42x42xi32>
    %c14_i32_212 = arith.constant 14 : i32
    %229 = vector.broadcast %c14_i32_212 : i32 to vector<42x42xi32>
    %230 = arith.muli %228, %229 : vector<42x42xi32>
    %231 = arith.subi %220, %230 : vector<42x42xi32>
    %c3_i32 = arith.constant 3 : i32
    %232 = vector.broadcast %c3_i32 : i32 to vector<42x42xi32>
    %233 = arith.muli %231, %232 : vector<42x42xi32>
    %234 = arith.addi %233, %228 : vector<42x42xi32>
    %235 = arith.cmpi eq, %221, %234 : vector<42x42xi32>
    %236 = arith.extui %235 : vector<42x42xi1> to vector<42x42xi32>
    %237 = arith.sitofp %236 : vector<42x42xi32> to vector<42x42xf32>
    %cst_213 = arith.constant dense<0.000000e+00> : vector<2x42xf32>
    %238 = tpu.matmul %219, %237, %cst_213 {dimension_numbers = #tpu.dot_dimension_numbers<[1], [0], [0], [1], [0, 0, 1, 1], [], []>} : vector<2x42xf32>, vector<42x42xf32>, vector<2x42xf32> -> vector<2x42xf32>
    %c0_214 = arith.constant 0 : index
    %c0_215 = arith.constant 0 : index
    %239 = vector.load %arg10[%c0_214, %c0_215] : memref<2x42xf32, #tpu.memory_space<vmem>>, vector<2x42xf32>
    tpu.vector_store %arg10[%c0_214, %c0_215], %238 {strides = array<i32>} : memref<2x42xf32, #tpu.memory_space<vmem>>, vector<2x42xf32>,
    %c0_216 = arith.constant 0 : index
    %c0_217 = arith.constant 0 : index
    %240 = vector.load %arg6[%c0_216, %c0_217] : memref<42x96xf32, #tpu.memory_space<vmem>>, vector<42x96xf32>
    %cst_218 = arith.constant dense<0.000000e+00> : vector<2x96xf32>
    %241 = tpu.matmul %238, %240, %cst_218 {dimension_numbers = #tpu.dot_dimension_numbers<[1], [0], [0], [1], [0, 0, 1, 1], [], []>} : vector<2x42xf32>, vector<42x96xf32>, vector<2x96xf32> -> vector<2x96xf32>
    %c0_219 = arith.constant 0 : index
    %c0_220 = arith.constant 0 : index
    %242 = vector.load %arg7[%c0_219, %c0_220] : memref<1x96xf32, #tpu.memory_space<vmem>>, vector<1x96xf32>
    %243 = vector.broadcast %242 : vector<1x96xf32> to vector<2x96xf32>
    %244 = arith.addf %241, %243 : vector<2x96xf32>
    %245 = vector.extract_strided_slice %244 {offsets = [0, 0], sizes = [2, 64], strides = [1, 1]} : vector<2x96xf32> to vector<2x64xf32>
    %c0_221 = arith.constant 0 : index
    %c0_222 = arith.constant 0 : index
    %246 = vector.load %arg11[%c0_221, %c0_222] : memref<2x64xf32, #tpu.memory_space<vmem>>, vector<2x64xf32>
    tpu.vector_store %arg11[%c0_221, %c0_222], %245 {strides = array<i32>} : memref<2x64xf32, #tpu.memory_space<vmem>>, vector<2x64xf32>,
    %247 = vector.extract_strided_slice %244 {offsets = [0, 64], sizes = [2, 32], strides = [1, 1]} : vector<2x96xf32> to vector<2x32xf32>
    %cst_223 = arith.constant 0.000000e+00 : f32
    %248 = vector.broadcast %cst_223 : f32 to vector<2x32xf32>
    %249 = arith.cmpf oge, %247, %248 : vector<2x32xf32>
    %cst_224 = arith.constant 0.00999999977 : f32
    %250 = vector.broadcast %cst_224 : f32 to vector<2x32xf32>
    %251 = arith.mulf %250, %247 : vector<2x32xf32>
    %252 = arith.select %249, %247, %251 : vector<2x32xi1>, vector<2x32xf32>
    %c0_225 = arith.constant 0 : index
    %c0_226 = arith.constant 0 : index
    %253 = vector.load %arg8[%c0_225, %c0_226] : memref<32x1xf32, #tpu.memory_space<vmem>>, vector<32x1xf32>
    %cst_227 = arith.constant dense<0.000000e+00> : vector<2x1xf32>
    %254 = tpu.matmul %252, %253, %cst_227 {dimension_numbers = #tpu.dot_dimension_numbers<[1], [0], [0], [1], [0, 0, 1, 1], [], []>} : vector<2x32xf32>, vector<32x1xf32>, vector<2x1xf32> -> vector<2x1xf32>
    %c0_228 = arith.constant 0 : index
    %c0_229 = arith.constant 0 : index
    %255 = vector.load %arg9[%c0_228, %c0_229] : memref<1x1xf32, #tpu.memory_space<vmem>>, vector<1x1xf32>
    %256 = vector.broadcast %255 : vector<1x1xf32> to vector<2x1xf32>
    %257 = arith.addf %254, %256 : vector<2x1xf32>
    %c0_230 = arith.constant 0 : index
    %c0_231 = arith.constant 0 : index
    %258 = vector.load %arg12[%c0_230, %c0_231] : memref<2x1xf32, #tpu.memory_space<vmem>>, vector<2x1xf32>
    tpu.vector_store %arg12[%c0_230, %c0_231], %257 {strides = array<i32>} : memref<2x1xf32, #tpu.memory_space<vmem>>, vector<2x1xf32>,
    return
  }
  func.func @transform_0(%arg0: i32) -> (i32, i32, i32) {
    %c0_i32 = arith.constant 0 : i32
    %c0_i32_0 = arith.constant 0 : i32
    %c0_i32_1 = arith.constant 0 : i32
    return %arg0, %c0_i32, %c0_i32_0 : i32, i32, i32
  }
  func.func @transform_1(%arg0: i32) -> (i32, i32, i32) {
    %c0_i32 = arith.constant 0 : i32
    %c0_i32_0 = arith.constant 0 : i32
    %c0_i32_1 = arith.constant 0 : i32
    %c0_i32_2 = arith.constant 0 : i32
    return %c0_i32, %c0_i32_0, %c0_i32_1 : i32, i32, i32
  }
  func.func @transform_2(%arg0: i32) -> (i32, i32) {
    %c0_i32 = arith.constant 0 : i32
    %c0_i32_0 = arith.constant 0 : i32
    %c0_i32_1 = arith.constant 0 : i32
    return %c0_i32, %c0_i32_0 : i32, i32
  }
  func.func @transform_3(%arg0: i32) -> (i32, i32, i32) {
    %c0_i32 = arith.constant 0 : i32
    %c0_i32_0 = arith.constant 0 : i32
    %c0_i32_1 = arith.constant 0 : i32
    %c0_i32_2 = arith.constant 0 : i32
    return %c0_i32, %c0_i32_0, %c0_i32_1 : i32, i32, i32
  }
  func.func @transform_4(%arg0: i32) -> (i32, i32) {
    %c0_i32 = arith.constant 0 : i32
    %c0_i32_0 = arith.constant 0 : i32
    %c0_i32_1 = arith.constant 0 : i32
    return %c0_i32, %c0_i32_0 : i32, i32
  }
  func.func @transform_5(%arg0: i32) -> (i32, i32) {
    %c0_i32 = arith.constant 0 : i32
    %c0_i32_0 = arith.constant 0 : i32
    %c0_i32_1 = arith.constant 0 : i32
    return %c0_i32, %c0_i32_0 : i32, i32
  }
  func.func @transform_6(%arg0: i32) -> (i32, i32) {
    %c0_i32 = arith.constant 0 : i32
    %c0_i32_0 = arith.constant 0 : i32
    %c0_i32_1 = arith.constant 0 : i32
    return %c0_i32, %c0_i32_0 : i32, i32
  }
  func.func @transform_7(%arg0: i32) -> (i32, i32) {
    %c0_i32 = arith.constant 0 : i32
    %c0_i32_0 = arith.constant 0 : i32
    %c0_i32_1 = arith.constant 0 : i32
    return %c0_i32, %c0_i32_0 : i32, i32
  }
  func.func @transform_8(%arg0: i32) -> (i32, i32) {
    %c0_i32 = arith.constant 0 : i32
    %c0_i32_0 = arith.constant 0 : i32
    %c0_i32_1 = arith.constant 0 : i32
    return %c0_i32, %c0_i32_0 : i32, i32
  }
  func.func @transform_9(%arg0: i32) -> (i32, i32) {
    %c0_i32 = arith.constant 0 : i32
    %c0_i32_0 = arith.constant 0 : i32
    return %arg0, %c0_i32 : i32, i32
  }
  func.func @transform_10(%arg0: i32) -> (i32, i32) {
    %c0_i32 = arith.constant 0 : i32
    %c0_i32_0 = arith.constant 0 : i32
    return %arg0, %c0_i32 : i32, i32
  }
  func.func @transform_11(%arg0: i32) -> (i32, i32) {
    %c0_i32 = arith.constant 0 : i32
    %c0_i32_0 = arith.constant 0 : i32
    return %arg0, %c0_i32 : i32, i32
  }
}

</mosaic_0001>

<bundles_post_ra>
// kernel: cnn_rul_forward.1
= control target key start
LH: loop header
LB: loop body
LE: loop exit
PB: predicated region body
PF: predicated region fallthrough
CT: control target
= control target key end

     0   :  { %s3766_s0 = inlined_call_operand.vmem [shape: f32[2,30,14], index: 0, kind: input, shape index: {}]   ;;  %s3767_s1 = inlined_call_operand.vmem [shape: f32[3,70,14], index: 1, kind: input, shape index: {}]   ;;  %s3768_s2 = inlined_call_operand.vmem [shape: f32[3,14], index: 2, kind: input, shape index: {}]   ;;  %s3769_s3 = inlined_call_operand.vmem [shape: f32[3,98,14], index: 3, kind: input, shape index: {}]   ;;  %s3770_s4 = inlined_call_operand.vmem [shape: f32[3,14], index: 4, kind: input, shape index: {}]   ;;  %s3771_s5 = inlined_call_operand.vmem [shape: f32[42,96], index: 5, kind: input, shape index: {}]   ;;  %s3772_s6 = inlined_call_operand.vmem [shape: f32[1,96], index: 6, kind: input, shape index: {}]   ;;  %s3773_s7 = inlined_call_operand.vmem [shape: f32[32,1], index: 7, kind: input, shape index: {}]   ;;  %s3774_s8 = inlined_call_operand.<no memory space> [shape: f32[1,1], index: 8, kind: input, shape index: {}]   ;;  %s3775_s9 = inlined_call_operand.hbm [shape: f32[2,42], index: 9, kind: output, shape index: {0}]   ;;  %s3776_s10 = inlined_call_operand.hbm [shape: f32[2,64], index: 10, kind: output, shape index: {1}]   ;;  %s3777_s11 = inlined_call_operand.vmem [shape: f32[2,1], index: 11, kind: output, shape index: {2}]  }
   0x1   :  { %v17_v0 = vstv %s3774_s8 }
   0x2   :  { %18 = vst [vmem:[#allocation4] sm:$0x1] %v17_v0 }
   0x3   :  { %19 = vsyncpa [#allocation6], 0  ;;  %v109_v1 = vld [vmem:[%s3766_s0] sm:$0xff]  ;;  %v110_v2 = vld [vmem:[%s3766_s0 + $0x8] sm:$0xff]  ;;  %vm113_vm0 = vcmask 113664   ;;  %vm117_vm1 = vcmask 111616  }
   0x4   :  { %v111_v3 = vld [vmem:[%s3766_s0 + $0x10] sm:$0xff]  ;;  %114 = vst.msk [vmem:[#allocation2 + $0x1] sm:$0xff] %vm113_vm0, %v109_v1  ;;  %115 = vst.msk [vmem:[#allocation2 + $0x9] sm:$0xff] %vm113_vm0, %v110_v2  ;;  %v112_v4 = vld [vmem:[%s3766_s0 + $0x18] sm:$0x3f]  ;;  %vm39_vm2 = vcmask 106496  }
   0x5   :  { %116 = vst.msk [vmem:[#allocation2 + $0x11] sm:$0xff] %vm113_vm0, %v111_v3  ;;  %v44_v5 = vld [vmem:[%s3767_s1] sm:$0xff]  ;;  %v45_v6 = vld [vmem:[%s3767_s1 + $0x8] sm:$0xff]  ;;  %v46_v7 = vld [vmem:[%s3767_s1 + $0x10] sm:$0xff]  ;;  %v2888_v10 = vmov 0.0  }
   0x6   :  { %118 = vst.msk [vmem:[#allocation2 + $0x19] sm:$0x3f] %vm117_vm1, %v112_v4  ;;  %v47_v8 = vld [vmem:[%s3767_s1 + $0x18] sm:$0xff]  ;;  %v2995_v9 = vpack.c.bf16 %v45_v6, %v44_v5  ;;  %v48_v12 = vld [vmem:[%s3767_s1 + $0x20] sm:$0xff]  ;;  %v49_v13 = vld [vmem:[%s3767_s1 + $0x28] sm:$0xff] }
   0x7   :  { %40 = vst.msk [vmem:[#allocation2] sm:$0x1] %vm39_vm2, %v2888_v10  ;;  %42 = vst.msk [vmem:[#allocation3] sm:$0x1] %vm39_vm2, %v2888_v10  ;;  %v2999_v11 = vpack.c.bf16 %v47_v8, %v46_v7 }
   0x8   :  { %20 = vsyncpa [#allocation8], 0  ;;  %2623 = vmatprep.subr.bf16.mxu0 %v2995_v9  ;;  %v3010_v14 = vpack.c.bf16 %v49_v13, %v48_v12  ;;  %v50_v15 = vld [vmem:[%s3767_s1 + $0x30] sm:$0xff]  ;;  %v51_v18 = vld [vmem:[%s3767_s1 + $0x38] sm:$0xff]  ;;  %s2889_s23 = smov 28   ;;  %s2890_s24 = smov 14  }
   0x9   :  { %2625 = vmatpush3.bf16.msra.mxu0 %v2995_v9  ;;  %v3022_v21 = vpack.c.bf16 %v51_v18, %v50_v15  ;;  %v3031_v24 = vld [vmem:[%s3767_s1 + $0x40] sm:$0x3f]  ;;  %vm192_vm3 = vcmask 1045504   ;;  %s2891_s26 = smov 42   ;;  %s2892_s27 = smov 56   ;;  %vm172_vm4 = vcmask 228352  }
   0xa   :  { %2627 = vmatprep.subr.bf16.mxu0 %v2999_v11  ;;  %vm175_vm5 = vcmask 343040   ;;  %vm178_vm6 = vcmask 457728   ;;  %vm185_vm7 = vcmask 572416   ;;  %v2140_v0 = vld [vmem:[%s3766_s0 + $0x30] sm:$0xff]  ;;  %v2141_v2 = vld [vmem:[%s3766_s0 + $0x38] sm:$0x3f] }
   0xb   :  { %v127_v16 = vld [vmem:[#allocation2 + $0x2] ss:$2 sm:$0xff]  ;;  %v123_v17 = vld [vmem:[#allocation2 + $0x1] ss:$2 sm:$0xff]  ;;  %v2893_v7 = vmov 0.0|0.0   ;;  %v79_v13 = vld [vmem:[%s3769_s3 + $0x18] sm:$0xff] }
   0xc   :  { %148 = vrot.lane.b32.xlu1 %v127_v16, %s2889_s23  ;;  %140 = vrot.lane.b32.xlu0 %v123_v17, %s2890_s24  ;;  %v131_v23 = vld [vmem:[#allocation2 + $0x3] ss:$2 sm:$0xff]  ;;  %v135_v26 = vld [vmem:[#allocation2 + $0x4] ss:$2 sm:$0xff]  ;;  %vm301_vm8 = vcmask 1041408   ;;  %vm2894_vm9 = vmmov 1  }
   0xd   :  { %v129_v19 = vld [vmem:[#allocation2 + $0x12] ss:$2 sm:$0x3f]  ;;  %v125_v20 = vld [vmem:[#allocation2 + $0x11] ss:$2 sm:$0x3f]  ;;  %2629 = vmatpush3.bf16.msra.mxu0 %v2999_v11  ;;  %2638 = vmatprep.subr.bf16.mxu1 %v2893_v7  ;;  %vm3139_vm10 = vmpackc.low %vm301_vm8, %vm2894_vm9 }
   0xe   :  { %2631 = vmatprep.subr.bf16.mxu0 %v3010_v14  ;;  %v133_v22 = vld [vmem:[#allocation2 + $0x13] ss:$2 sm:$0x3f]  ;;  %v137_v25 = vld [vmem:[#allocation2 + $0x14] ss:$2 sm:$0x3f] }
   0xf   :  { %v119_v31 = vld [vmem:[#allocation2] ss:$2 sm:$0xff]  ;;  %v121_v32 = vld [vmem:[#allocation2 + $0x10] ss:$2 sm:$0x3f]  ;;  %vm2895_vm12 = vmmov 0  }
  0x10   :  { %150 = vrot.lane.b32.xlu1 %v129_v19, %s2889_s23  ;;  %142 = vrot.lane.b32.xlu0 %v125_v20, %s2890_s24  ;;  %v3052_v45 = vld [vmem:[#allocation2 + $0x10] ss:$2 sm:$0x3f]  ;;  %v3056_v47 = vld [vmem:[#allocation2] ss:$2 sm:$0xff]  ;;  %s2897_s19 = smov 70  }
  0x11   :  { %2633 = vmatpush3.bf16.msra.mxu0 %v3010_v14  ;;  %v3054_v46 = vld [vmem:[#allocation2 + $0x10] ss:$2 sm:$0x3f]  ;;  %v3058_v48 = vld [vmem:[#allocation2] ss:$2 sm:$0xff]  ;;  %2358 = vmatprep.mubr.msk.f32.mxu1 %vm2895_vm12, %v2888_v10  ;;  %s2901_s8 = smov 64  }
  0x12   :  { %2635 = vmatprep.subr.bf16.mxu0 %v3022_v21  ;;  %v3060_v49 = vld [vmem:[#allocation2 + $0x11] ss:$2 sm:$0x3f]  ;;  %v3062_v50 = vld [vmem:[#allocation2 + $0x1] ss:$2 sm:$0xff] }
  0x13   :  { %v3064_v51 = vld [vmem:[#allocation2 + $0x12] ss:$2 sm:$0x3f]  ;;  %v3066_v52 = vld [vmem:[#allocation2 + $0x2] ss:$2 sm:$0xff] }
  0x14   :  { %158 = vrot.lane.b32.xlu1 %v133_v22, %s2891_s26  ;;  %156 = vrot.lane.b32.xlu0 %v131_v23, %s2891_s26  ;;  %v3068_v53 = vld [vmem:[#allocation2 + $0x13] ss:$2 sm:$0x3f]  ;;  %v3070_v54 = vld [vmem:[#allocation2 + $0x3] ss:$2 sm:$0xff] }
  0x15   :  { %2637 = vmatpush3.bf16.msra.mxu0 %v3022_v21  ;;  %v3072_v55 = vld [vmem:[#allocation2 + $0x14] ss:$2 sm:$0x3f]  ;;  %v3074_v56 = vld [vmem:[#allocation2 + $0x4] ss:$2 sm:$0xff] }
  0x16   :  { %2341 = vmatprep.subr.msk.mxu0 %vm192_vm3, %v3031_v24  ;;  %v3076_v57 = vld [vmem:[#allocation2 + $0x11] ss:$2 sm:$0x3f]  ;;  %v3078_v58 = vld [vmem:[#allocation2 + $0x1] ss:$2 sm:$0xff] }
  0x17   :  { %v3080_v59 = vld [vmem:[#allocation2 + $0x12] ss:$2 sm:$0x3f]  ;;  %v3082_v60 = vld [vmem:[#allocation2 + $0x2] ss:$2 sm:$0xff] }
  0x18   :  { %166 = vrot.lane.b32.xlu1 %v137_v25, %s2892_s27  ;;  %164 = vrot.lane.b32.xlu0 %v135_v26, %s2892_s27  ;;  %v3084_v61 = vld [vmem:[#allocation2 + $0x13] ss:$2 sm:$0x3f]  ;;  %v3086_v62 = vld [vmem:[#allocation2 + $0x3] ss:$2 sm:$0xff] }
  0x19   :  { %2342 = vmatpush3.msk.msra.mxu0 %vm192_vm3, %v3031_v24  ;;  %v3088_v63 = vld [vmem:[#allocation2 + $0x14] ss:$2 sm:$0x3f]  ;;  %v3093_v1 = vld [vmem:[#allocation2 + $0x4] ss:$2 sm:$0xff] }
  0x1a   :  { %v2138_v3 = vld [vmem:[%s3766_s0 + $0x20] sm:$0xff]  ;;  %945 = vst.msk [vmem:[#allocation2 + $0x11] sm:$0xff] %vm113_vm0, %v2140_v0  ;;  %v2139_v4 = vld [vmem:[%s3766_s0 + $0x28] sm:$0xff]  ;;  %v78_v12 = vld [vmem:[%s3769_s3 + $0x10] sm:$0xff]  ;;  %2664 = vmatprep.subr.bf16.mxu0 %v2893_v7 }
  0x1b   :  { %946 = vst.msk [vmem:[#allocation2 + $0x19] sm:$0x3f] %vm117_vm1, %v2141_v2  ;;  %v76_v5 = vld [vmem:[%s3769_s3] sm:$0xff]  ;;  %v77_v6 = vld [vmem:[%s3769_s3 + $0x8] sm:$0xff]  ;;  %v3125_v15 = vpack.c.bf16 %v79_v13, %v78_v12  ;;  %v2079_v0 = vld [vmem:[%s3767_s1 + $0x58] sm:$0xff] }
  0x1c   :  { %943 = vst.msk [vmem:[#allocation2 + $0x1] sm:$0xff] %vm113_vm0, %v2138_v3  ;;  %944 = vst.msk [vmem:[#allocation2 + $0x9] sm:$0xff] %vm113_vm0, %v2139_v4  ;;  %v3115_v8 = vpack.c.bf16 %v77_v6, %v76_v5  ;;  %v80_v16 = vld [vmem:[%s3769_s3 + $0x20] sm:$0xff]  ;;  %v81_v17 = vld [vmem:[%s3769_s3 + $0x28] sm:$0xff] }
  0x1d   :  { %v3135_v18 = vpack.c.bf16 %v81_v17, %v80_v16  ;;  %v3149_v20 = vld [vmem:[%s3768_s2] ss:$0 sm:$0xff]  ;;  %v2077_v26 = vld [vmem:[%s3767_s1 + $0x48] sm:$0xff]  ;;  %v2082_v16 = vld [vmem:[%s3767_s1 + $0x70] sm:$0xff] }
  0x1e   :  { %2640 = vmatpush3.bf16.msra.mxu1 %v3115_v8  ;;  %v2081_v13 = vld [vmem:[%s3767_s1 + $0x68] sm:$0xff] }
  0x1f   :  { %2641 = vmatprep.subr.bf16.mxu1 %v2893_v7 }
  0x22   :  { %2643 = vmatpush3.bf16.msra.mxu1 %v3125_v15 }
  0x23   :  { %2644 = vmatprep.subr.bf16.mxu1 %v2893_v7 }
  0x26   :  { %2647 = vmatpush3.bf16.msk.msra.mxu1 %vm3139_vm10, %v3135_v18 }
  0x7e   :  { %v149_v27 = vpop.permute.xlu1 %148  ;;  %v141_v28 = vpop.permute.xlu0 %140 }
  0x7f   :  { %v170_v33 = vsel %vm113_vm0, %v119_v31, %v141_v28 }
  0x80   :  { %v173_v38 = vsel %vm172_vm4, %v170_v33, %v149_v27  ;;  %v2078_v27 = vld [vmem:[%s3767_s1 + $0x50] sm:$0xff] }
  0x82   :  { %v151_v29 = vpop.permute.xlu1 %150  ;;  %v143_v30 = vpop.permute.xlu0 %142 }
  0x83   :  { %v171_v34 = vsel %vm113_vm0, %v121_v32, %v143_v30 }
  0x84   :  { %v174_v37 = vsel %vm172_vm4, %v171_v34, %v151_v29  ;;  %v3159_v29 = vpack.c.bf16 %v2078_v27, %v2077_v26  ;;  %v2084_v26 = vld [vmem:[%s3767_s1 + $0x80] sm:$0xff] }
  0x86   :  { %v159_v35 = vpop.permute.xlu1 %158  ;;  %v157_v36 = vpop.permute.xlu0 %156  ;;  %2649 = vmatprep.subr.bf16.mxu1 %v3159_v29 }
  0x87   :  { %v177_v39 = vsel %vm175_vm5, %v174_v37, %v159_v35  ;;  %v176_v40 = vsel %vm175_vm5, %v173_v38, %v157_v36  ;;  %v950_v36 = vld [vmem:[#allocation2 + $0x11] ss:$2 sm:$0x3f]  ;;  %v949_v37 = vld [vmem:[#allocation2 + $0x1] ss:$2 sm:$0xff] }
  0x88   :  { %v952_v38 = vld [vmem:[#allocation2 + $0x12] ss:$2 sm:$0x3f] }
  0x8a   :  { %v167_v41 = vpop.permute.xlu1 %166  ;;  %v165_v42 = vpop.permute.xlu0 %164 }
  0x8b   :  { %v180_v43 = vsel %vm178_vm6, %v177_v39, %v167_v41  ;;  %v179_v44 = vsel %vm178_vm6, %v176_v40, %v165_v42  ;;  %v951_v39 = vld [vmem:[#allocation2 + $0x2] ss:$2 sm:$0xff]  ;;  %v954_v40 = vld [vmem:[#allocation2 + $0x13] ss:$2 sm:$0x3f] }
  0x8c   :  { %2343 = vmatprep.mubr.msk.f32.mxu0 %vm185_vm7, %v179_v44  ;;  %v953_v41 = vld [vmem:[#allocation2 + $0x3] ss:$2 sm:$0xff]  ;;  %v956_v42 = vld [vmem:[#allocation2 + $0x14] ss:$2 sm:$0x3f] }
  0x8d   :  { %2344 = vmatmul.mubr.msk.f32.vlgmr.msra.gmra.mrb[0].mxu0 %vm185_vm7, %v180_v43  ;;  %v955_v43 = vld [vmem:[#allocation2 + $0x4] ss:$2 sm:$0xff]  ;;  %v1184_v44 = vld [vmem:[#allocation2 + $0x1] ss:$2 sm:$0xff] }
  0x8e   :  { %2400 = vmatprep.mubr.msk.f32.mxu0 %vm2895_vm12, %v2888_v10 }
 0x160   :  { %v2345_v22 = vpop.f32.mrb[0].mxu0 }
 0x161   :  { %v268_v23 = vadd.f32 %v2345_v22, %v3149_v20  ;;  %v262_v25 = vpop.f32.mrb[1].mxu0 }
 0x162   :  { %v263_v28 = vadd.f32 %v3149_v20, %v262_v25  ;;  %v2083_v25 = vld [vmem:[%s3767_s1 + $0x78] sm:$0xff] }
 0x163   :  { %vm272_vm11 = vcmp.ge.f32.partialorder %v268_v23, 0.0  ;;  %v274_v30 = vmul.f32 0.01, %v268_v23 }
 0x164   :  { %vm271_vm13 = vcmp.ge.f32.partialorder %v263_v28, 0.0  ;;  %v273_v31 = vmul.f32 0.01, %v263_v28 }
 0x165   :  { %v276_v32 = vsel %vm272_vm11, %v268_v23, %v274_v30  ;;  %v3245_v23 = vpack.c.bf16 %v2082_v16, %v2081_v13  ;;  %v3255_v30 = vpack.c.bf16 %v2084_v26, %v2083_v25 }
 0x166   :  { %278 = vst.msk [vmem:[#allocation3 + $0x9] sm:$0x3f] %vm117_vm1, %v276_v32  ;;  %v275_v33 = vsel %vm271_vm13, %v263_v28, %v273_v31 }
 0x167   :  { %277 = vst.msk [vmem:[#allocation3 + $0x1] sm:$0xff] %vm113_vm0, %v275_v33 }
 0x16e   :  { %v283_v34 = vld [vmem:[#allocation3 + $0x8] ss:$2 sm:$0xf]  ;;  %v279_v4 = vld [vmem:[#allocation3] ss:$2 sm:$0xf] }
 0x16f   :  { %v281_v35 = vld [vmem:[#allocation3 + $0x4] ss:$2 sm:$0xf]  ;;  %289 = vrot.lane.b32.xlu1 %v283_v34, %s2889_s23 }
 0x170   :  { %285 = vrot.lane.b32.xlu0 %v281_v35, %s2890_s24  ;;  %v3264_v34 = vld [vmem:[%s3767_s1 + $0x88] sm:$0x3f]  ;;  %v2086_v35 = vld [vmem:[%s3767_s1 + $0x90] sm:$0xff] }
 0x173   :  { %400 = vrot.lane.b32.xlu1 %v3060_v49, %s2890_s24  ;;  %v1185_v49 = vld [vmem:[#allocation2 + $0x11] ss:$2 sm:$0x3f] }
 0x174   :  { %398 = vrot.lane.b32.xlu0 %v3062_v50, %s2890_s24  ;;  %v1186_v50 = vld [vmem:[#allocation2 + $0x2] ss:$2 sm:$0xff] }
 0x177   :  { %408 = vrot.lane.b32.xlu1 %v3064_v51, %s2889_s23  ;;  %v1187_v51 = vld [vmem:[#allocation2 + $0x12] ss:$2 sm:$0x3f] }
 0x178   :  { %406 = vrot.lane.b32.xlu0 %v3066_v52, %s2889_s23  ;;  %v1188_v52 = vld [vmem:[#allocation2 + $0x3] ss:$2 sm:$0xff] }
 0x17b   :  { %416 = vrot.lane.b32.xlu1 %v3068_v53, %s2891_s26  ;;  %v1189_v53 = vld [vmem:[#allocation2 + $0x13] ss:$2 sm:$0x3f] }
 0x17c   :  { %414 = vrot.lane.b32.xlu0 %v3070_v54, %s2891_s26  ;;  %v1190_v54 = vld [vmem:[#allocation2 + $0x4] ss:$2 sm:$0xff] }
 0x17f   :  { %424 = vrot.lane.b32.xlu1 %v3072_v55, %s2892_s27  ;;  %v1191_v55 = vld [vmem:[#allocation2 + $0x14] ss:$2 sm:$0x3f] }
 0x180   :  { %422 = vrot.lane.b32.xlu0 %v3074_v56, %s2892_s27  ;;  %v1431_v56 = vld [vmem:[#allocation2 + $0x1] ss:$2 sm:$0xff] }
 0x183   :  { %663 = vrot.lane.b32.xlu1 %v3076_v57, %s2890_s24  ;;  %v1432_v57 = vld [vmem:[#allocation2 + $0x11] ss:$2 sm:$0x3f] }
 0x184   :  { %661 = vrot.lane.b32.xlu0 %v3078_v58, %s2890_s24  ;;  %v1433_v58 = vld [vmem:[#allocation2 + $0x2] ss:$2 sm:$0xff] }
 0x187   :  { %671 = vrot.lane.b32.xlu1 %v3080_v59, %s2889_s23  ;;  %v1434_v59 = vld [vmem:[#allocation2 + $0x12] ss:$2 sm:$0x3f] }
 0x188   :  { %669 = vrot.lane.b32.xlu0 %v3082_v60, %s2889_s23  ;;  %v1435_v60 = vld [vmem:[#allocation2 + $0x3] ss:$2 sm:$0xff] }
 0x18b   :  { %679 = vrot.lane.b32.xlu1 %v3084_v61, %s2891_s26  ;;  %v1436_v61 = vld [vmem:[#allocation2 + $0x13] ss:$2 sm:$0x3f] }
 0x18c   :  { %677 = vrot.lane.b32.xlu0 %v3086_v62, %s2891_s26  ;;  %v1437_v62 = vld [vmem:[#allocation2 + $0x4] ss:$2 sm:$0xff] }
 0x18f   :  { %687 = vrot.lane.b32.xlu1 %v3088_v63, %s2892_s27  ;;  %v1438_v63 = vld [vmem:[#allocation2 + $0x14] ss:$2 sm:$0x3f] }
 0x190   :  { %685 = vrot.lane.b32.xlu0 %v3093_v1, %s2892_s27  ;;  %v2080_v1 = vld [vmem:[%s3767_s1 + $0x60] sm:$0xff] }
 0x191   :  { %v3233_v6 = vpack.c.bf16 %v2080_v1, %v2079_v0 }
 0x193   :  { %961 = vrot.lane.b32.xlu1 %v950_v36, %s2890_s24  ;;  %v2087_v36 = vld [vmem:[%s3767_s1 + $0x98] sm:$0xff] }
 0x194   :  { %959 = vrot.lane.b32.xlu0 %v949_v37, %s2890_s24 }
 0x197   :  { %969 = vrot.lane.b32.xlu1 %v952_v38, %s2889_s23 }
 0x198   :  { %967 = vrot.lane.b32.xlu0 %v951_v39, %s2889_s23 }
 0x19b   :  { %977 = vrot.lane.b32.xlu1 %v954_v40, %s2891_s26 }
 0x19c   :  { %975 = vrot.lane.b32.xlu0 %v953_v41, %s2891_s26  ;;  %v2088_v41 = vld [vmem:[%s3767_s1 + $0xa0] sm:$0xff] }
 0x19f   :  { %985 = vrot.lane.b32.xlu1 %v956_v42, %s2892_s27  ;;  %v2089_v42 = vld [vmem:[%s3767_s1 + $0xa8] sm:$0xff] }
 0x1a0   :  { %983 = vrot.lane.b32.xlu0 %v955_v43, %s2892_s27 }
 0x1a3   :  { %1196 = vrot.lane.b32.xlu1 %v1185_v49, %s2890_s24 }
 0x1a4   :  { %1194 = vrot.lane.b32.xlu0 %v1184_v44, %s2890_s24 }
 0x1a7   :  { %1204 = vrot.lane.b32.xlu1 %v1187_v51, %s2889_s23 }
 0x1a8   :  { %1202 = vrot.lane.b32.xlu0 %v1186_v50, %s2889_s23  ;;  %v3291_v50 = vpack.c.bf16 %v2089_v42, %v2088_v41  ;;  %v1182_v42 = vld [vmem:[#allocation2] ss:$2 sm:$0xff] }
 0x1ab   :  { %1212 = vrot.lane.b32.xlu1 %v1189_v53, %s2891_s26 }
 0x1ac   :  { %1210 = vrot.lane.b32.xlu0 %v1188_v52, %s2891_s26 }
 0x1af   :  { %1220 = vrot.lane.b32.xlu1 %v1191_v55, %s2892_s27  ;;  %v2091_v55 = vld [vmem:[%s3767_s1 + $0xb8] sm:$0xff] }
 0x1b0   :  { %1218 = vrot.lane.b32.xlu0 %v1190_v54, %s2892_s27  ;;  %v2090_v54 = vld [vmem:[%s3767_s1 + $0xb0] sm:$0xff] }
 0x1b3   :  { %1443 = vrot.lane.b32.xlu1 %v1432_v57, %s2890_s24 }
 0x1b4   :  { %1441 = vrot.lane.b32.xlu0 %v1431_v56, %s2890_s24  ;;  %v3306_v56 = vpack.c.bf16 %v2091_v55, %v2090_v54 }
 0x1b7   :  { %1451 = vrot.lane.b32.xlu1 %v1434_v59, %s2889_s23  ;;  %v2092_v59 = vld [vmem:[%s3767_s1 + $0xc0] sm:$0xff] }
 0x1b8   :  { %1449 = vrot.lane.b32.xlu0 %v1433_v58, %s2889_s23 }
 0x1bb   :  { %1459 = vrot.lane.b32.xlu1 %v1436_v61, %s2891_s26 }
 0x1bc   :  { %1457 = vrot.lane.b32.xlu0 %v1435_v60, %s2891_s26  ;;  %v2093_v60 = vld [vmem:[%s3767_s1 + $0xc8] sm:$0xff] }
 0x1bf   :  { %1467 = vrot.lane.b32.xlu1 %v1438_v63, %s2892_s27 }
 0x1c0   :  { %1465 = vrot.lane.b32.xlu0 %v1437_v62, %s2892_s27  ;;  %v3318_v62 = vpack.c.bf16 %v2093_v60, %v2092_v59  ;;  %v1429_v60 = vld [vmem:[#allocation2] ss:$2 sm:$0xff] }
 0x1e1   :  { %v290_v2 = vpop.permute.xlu1 %289 }
 0x1e2   :  { %v286_v3 = vpop.permute.xlu0 %285 }
 0x1e3   :  { %v292_v5 = vsel %vm113_vm0, %v279_v4, %v286_v3 }
 0x1e4   :  { %v293_v12 = vsel %vm172_vm4, %v292_v5, %v290_v2  ;;  %v3329_v5 = vld [vmem:[%s3767_s1 + $0xd0] sm:$0x3f] }
 0x1e5   :  { %2359 = vmatmul.mubr.msk.f32.vlgmr.msra.gmra.mrb[0].mxu1 %vm175_vm5, %v293_v12  ;;  %v401_v17 = vpop.permute.xlu1 %400 }
 0x1e6   :  { %2651 = vmatpush3.bf16.msra.mxu1 %v3159_v29  ;;  %v399_v22 = vpop.permute.xlu0 %398  ;;  %v429_v37 = vsel %vm113_vm0, %v3052_v45, %v401_v17  ;;  %v3286_v45 = vpack.c.bf16 %v2087_v36, %v2086_v35 }
 0x1e7   :  { %2653 = vmatprep.subr.bf16.mxu1 %v3233_v6  ;;  %v428_v33 = vsel %vm113_vm0, %v3056_v47, %v399_v22  ;;  %v947_v22 = vld [vmem:[#allocation2] ss:$2 sm:$0xff] }
 0x1e9   :  { %v409_v27 = vpop.permute.xlu1 %408 }
 0x1ea   :  { %2655 = vmatpush3.bf16.msra.mxu1 %v3233_v6  ;;  %v407_v28 = vpop.permute.xlu0 %406  ;;  %v431_v44 = vsel %vm172_vm4, %v429_v37, %v409_v27 }
 0x1eb   :  { %2657 = vmatprep.subr.bf16.mxu1 %v3245_v23  ;;  %v430_v38 = vsel %vm172_vm4, %v428_v33, %v407_v28 }
 0x1ed   :  { %v417_v31 = vpop.permute.xlu1 %416 }
 0x1ee   :  { %2659 = vmatpush3.bf16.msra.mxu1 %v3245_v23  ;;  %v415_v32 = vpop.permute.xlu0 %414  ;;  %v433_v49 = vsel %vm175_vm5, %v431_v44, %v417_v31 }
 0x1ef   :  { %2661 = vmatprep.subr.bf16.mxu1 %v3255_v30  ;;  %v432_v47 = vsel %vm175_vm5, %v430_v38, %v415_v32  ;;  %v948_v32 = vld [vmem:[#allocation2 + $0x10] ss:$2 sm:$0x3f] }
 0x1f1   :  { %v425_v39 = vpop.permute.xlu1 %424 }
 0x1f2   :  { %2663 = vmatpush3.bf16.msra.mxu1 %v3255_v30  ;;  %v423_v40 = vpop.permute.xlu0 %422  ;;  %v435_v51 = vsel %vm178_vm6, %v433_v49, %v425_v39 }
 0x1f3   :  { %v434_v43 = vsel %vm178_vm6, %v432_v47, %v423_v40  ;;  %2377 = vmatprep.subr.msk.mxu1 %vm192_vm3, %v3264_v34 }
 0x1f4   :  { %2379 = vmatprep.mubr.msk.f32.mxu1 %vm185_vm7, %v434_v43 }
 0x1f5   :  { %v664_v52 = vpop.permute.xlu1 %663 }
 0x1f6   :  { %2378 = vmatpush3.msk.msra.mxu1 %vm192_vm3, %v3264_v34  ;;  %v662_v53 = vpop.permute.xlu0 %661  ;;  %v692_v2 = vsel %vm113_vm0, %v3054_v46, %v664_v52 }
 0x1f7   :  { %2380 = vmatmul.mubr.msk.f32.vlgmr.msra.gmra.mrb[2].mxu1 %vm185_vm7, %v435_v51  ;;  %2677 = vmatprep.subr.bf16.mxu1 %v3286_v45  ;;  %v691_v61 = vsel %vm113_vm0, %v3058_v48, %v662_v53  ;;  %v1183_v53 = vld [vmem:[#allocation2 + $0x10] ss:$2 sm:$0x3f] }
 0x1f8   :  { %2679 = vmatpush3.bf16.msra.mxu1 %v3286_v45 }
 0x1f9   :  { %2681 = vmatprep.subr.bf16.mxu1 %v3291_v50  ;;  %v672_v57 = vpop.permute.xlu1 %671 }
 0x1fa   :  { %v670_v58 = vpop.permute.xlu0 %669  ;;  %v694_v13 = vsel %vm172_vm4, %v692_v2, %v672_v57 }
 0x1fb   :  { %v693_v1 = vsel %vm172_vm4, %v691_v61, %v670_v58 }
 0x1fc   :  { %2683 = vmatpush3.bf16.msra.mxu1 %v3291_v50 }
 0x1fd   :  { %2685 = vmatprep.subr.bf16.mxu1 %v3306_v56  ;;  %v680_v63 = vpop.permute.xlu1 %679 }
 0x1fe   :  { %v678_v0 = vpop.permute.xlu0 %677  ;;  %v696_v17 = vsel %vm175_vm5, %v694_v13, %v680_v63 }
 0x1ff   :  { %v695_v3 = vsel %vm175_vm5, %v693_v1, %v678_v0 }
 0x200   :  { %2687 = vmatpush3.bf16.msra.mxu1 %v3306_v56 }
 0x201   :  { %2689 = vmatprep.subr.bf16.mxu1 %v3318_v62  ;;  %v688_v48 = vpop.permute.xlu1 %687 }
 0x202   :  { %v686_v4 = vpop.permute.xlu0 %685  ;;  %v698_v25 = vsel %vm178_vm6, %v696_v17, %v688_v48  ;;  %v1430_v48 = vld [vmem:[#allocation2 + $0x10] ss:$2 sm:$0x3f] }
 0x203   :  { %v697_v12 = vsel %vm178_vm6, %v695_v3, %v686_v4  ;;  %v2097_v17 = vld [vmem:[%s3769_s3 + $0x78] sm:$0xff] }
 0x204   :  { %2691 = vmatpush3.bf16.msra.mxu1 %v3318_v62  ;;  %2421 = vmatprep.mubr.msk.f32.mxu1 %vm185_vm7, %v697_v12 }
 0x205   :  { %2419 = vmatprep.subr.msk.mxu1 %vm192_vm3, %v3329_v5  ;;  %v962_v46 = vpop.permute.xlu1 %961 }
 0x206   :  { %v960_v16 = vpop.permute.xlu0 %959  ;;  %v990_v37 = vsel %vm113_vm0, %v948_v32, %v962_v46 }
 0x207   :  { %v989_v26 = vsel %vm113_vm0, %v947_v22, %v960_v16  ;;  %v2098_v22 = vld [vmem:[%s3769_s3 + $0x80] sm:$0xff] }
 0x208   :  { %2420 = vmatpush3.msk.msra.mxu1 %vm192_vm3, %v3329_v5 }
 0x209   :  { %2422 = vmatmul.mubr.msk.f32.vlgmr.msra.gmra.mrb[4].mxu1 %vm185_vm7, %v698_v25  ;;  %2711 = vmatprep.subr.bf16.mxu1 %v2995_v9  ;;  %v970_v27 = vpop.permute.xlu1 %969  ;;  %v3426_v25 = vpack.c.bf16 %v2098_v22, %v2097_v17 }
 0x20a   :  { %2713 = vmatpush3.bf16.msra.mxu1 %v2995_v9  ;;  %v968_v28 = vpop.permute.xlu0 %967  ;;  %v992_v39 = vsel %vm172_vm4, %v990_v37, %v970_v27  ;;  %v2100_v27 = vld [vmem:[%s3769_s3 + $0x90] sm:$0xff] }
 0x20b   :  { %2715 = vmatprep.subr.bf16.mxu1 %v2999_v11  ;;  %v991_v31 = vsel %vm172_vm4, %v989_v26, %v968_v28  ;;  %v2099_v26 = vld [vmem:[%s3769_s3 + $0x88] sm:$0xff] }
 0x20c   :  { %v3436_v28 = vpack.c.bf16 %v2100_v27, %v2099_v26 }
 0x20d   :  { %v978_v33 = vpop.permute.xlu1 %977 }
 0x20e   :  { %2717 = vmatpush3.bf16.msra.mxu1 %v2999_v11  ;;  %v976_v35 = vpop.permute.xlu0 %975  ;;  %v994_v41 = vsel %vm175_vm5, %v992_v39, %v978_v33  ;;  %v3446_v33 = vld [vmem:[%s3768_s2 + $0x1] ss:$0 sm:$0xff] }
 0x20f   :  { %2719 = vmatprep.subr.bf16.mxu1 %v3010_v14  ;;  %v993_v36 = vsel %vm175_vm5, %v991_v31, %v976_v35 }
 0x211   :  { %v986_v9 = vpop.permute.xlu1 %985 }
 0x212   :  { %2721 = vmatpush3.bf16.msra.mxu1 %v3010_v14  ;;  %v984_v38 = vpop.permute.xlu0 %983  ;;  %v996_v14 = vsel %vm178_vm6, %v994_v41, %v986_v9 }
 0x213   :  { %v995_v47 = vsel %vm178_vm6, %v993_v36, %v984_v38  ;;  %2723 = vmatprep.subr.bf16.mxu1 %v3022_v21  ;;  %v2101_v38 = vld [vmem:[%s3769_s3 + $0x98] sm:$0xff] }
 0x214   :  { %2471 = vmatprep.mubr.msk.f32.mxu1 %vm185_vm7, %v995_v47  ;;  %v2102_v47 = vld [vmem:[%s3769_s3 + $0xa0] sm:$0xff] }
 0x215   :  { %v1197_v40 = vpop.permute.xlu1 %1196 }
 0x216   :  { %2725 = vmatpush3.bf16.msra.mxu1 %v3022_v21  ;;  %v1195_v11 = vpop.permute.xlu0 %1194  ;;  %v1225_v55 = vsel %vm113_vm0, %v1183_v53, %v1197_v40 }
 0x217   :  { %2469 = vmatprep.subr.msk.mxu1 %vm192_vm3, %v3031_v24  ;;  %v1224_v43 = vsel %vm113_vm0, %v1182_v42, %v1195_v11  ;;  %v3456_v11 = vpack.c.bf16 %v2102_v47, %v2101_v38 }
 0x219   :  { %v1205_v49 = vpop.permute.xlu1 %1204 }
 0x21a   :  { %2470 = vmatpush3.msk.msra.mxu1 %vm192_vm3, %v3031_v24  ;;  %v1203_v44 = vpop.permute.xlu0 %1202  ;;  %v1227_v58 = vsel %vm172_vm4, %v1225_v55, %v1205_v49  ;;  %v3475_v49 = vld [vmem:[%s3768_s2 + $0x2] ss:$0 sm:$0xff]  ;;  %s2896_s2 = smov 84  }
 0x21b   :  { %2472 = vmatmul.mubr.msk.f32.vlgmr.msra.gmra.mrb[6].mxu1 %vm185_vm7, %v996_v14  ;;  %2737 = vmatprep.subr.bf16.mxu1 %v3159_v29  ;;  %v1226_v21 = vsel %vm172_vm4, %v1224_v43, %v1203_v44  ;;  %v3465_v14 = vld [vmem:[%s3769_s3 + $0xa8] sm:$0xff] }
 0x21c   :  { %2739 = vmatpush3.bf16.msra.mxu1 %v3159_v29 }
 0x21d   :  { %2741 = vmatprep.subr.bf16.mxu1 %v3233_v6  ;;  %v1213_v52 = vpop.permute.xlu1 %1212 }
 0x21e   :  { %v1211_v51 = vpop.permute.xlu0 %1210 }
 0x21f   :  { %v1228_v54 = vsel %vm175_vm5, %v1226_v21, %v1211_v51 }
 0x220   :  { %2743 = vmatpush3.bf16.msra.mxu1 %v3233_v6  ;;  %v1229_v6 = vsel %vm175_vm5, %v1227_v58, %v1213_v52 }
 0x221   :  { %2745 = vmatprep.subr.bf16.mxu1 %v3245_v23  ;;  %v1221_v29 = vpop.permute.xlu1 %1220 }
 0x222   :  { %v1219_v24 = vpop.permute.xlu0 %1218  ;;  %v1231_v0 = vsel %vm178_vm6, %v1229_v6, %v1221_v29 }
 0x223   :  { %v1230_v57 = vsel %vm178_vm6, %v1228_v54, %v1219_v24 }
 0x224   :  { %2747 = vmatpush3.bf16.msra.mxu1 %v3245_v23  ;;  %2507 = vmatprep.mubr.msk.f32.mxu1 %vm185_vm7, %v1230_v57 }
 0x225   :  { %2749 = vmatprep.subr.bf16.mxu1 %v3255_v30  ;;  %v1444_v61 = vpop.permute.xlu1 %1443 }
 0x226   :  { %v1442_v59 = vpop.permute.xlu0 %1441  ;;  %v1472_v12 = vsel %vm113_vm0, %v1430_v48, %v1444_v61 }
 0x227   :  { %v1471_v63 = vsel %vm113_vm0, %v1429_v60, %v1442_v59 }
 0x228   :  { %2751 = vmatpush3.bf16.msra.mxu1 %v3255_v30 }
 0x229   :  { %2505 = vmatprep.subr.msk.mxu1 %vm192_vm3, %v3264_v34  ;;  %v1452_v2 = vpop.permute.xlu1 %1451 }
 0x22a   :  { %v1450_v23 = vpop.permute.xlu0 %1449 }
 0x22b   :  { %v1473_v30 = vsel %vm172_vm4, %v1471_v63, %v1450_v23 }
 0x22c   :  { %2506 = vmatpush3.msk.msra.mxu1 %vm192_vm3, %v3264_v34 }
 0x22d   :  { %2508 = vmatmul.mubr.msk.f32.vlgmr.msra.gmra.mrb[8].mxu1 %vm185_vm7, %v1231_v0  ;;  %2765 = vmatprep.subr.bf16.mxu1 %v3286_v45  ;;  %v1460_v13 = vpop.permute.xlu1 %1459 }
 0x22e   :  { %2767 = vmatpush3.bf16.msra.mxu1 %v3286_v45  ;;  %v1458_v1 = vpop.permute.xlu0 %1457  ;;  %v1474_v45 = vsel %vm172_vm4, %v1472_v12, %v1452_v2 }
 0x22f   :  { %2769 = vmatprep.subr.bf16.mxu1 %v3291_v50  ;;  %v1475_v3 = vsel %vm175_vm5, %v1473_v30, %v1458_v1 }
 0x231   :  { %v1468_v46 = vpop.permute.xlu1 %1467 }
 0x232   :  { %2771 = vmatpush3.bf16.msra.mxu1 %v3291_v50  ;;  %v1466_v4 = vpop.permute.xlu0 %1465  ;;  %v1476_v50 = vsel %vm175_vm5, %v1474_v45, %v1460_v13 }
 0x233   :  { %2773 = vmatprep.subr.bf16.mxu1 %v3306_v56  ;;  %v1477_v34 = vsel %vm178_vm6, %v1475_v3, %v1466_v4  ;;  %v1478_v16 = vsel %vm178_vm6, %v1476_v50, %v1468_v46 }
 0x234   :  { %2549 = vmatprep.mubr.msk.f32.mxu1 %vm185_vm7, %v1477_v34 }
 0x236   :  { %2775 = vmatpush3.bf16.msra.mxu1 %v3306_v56  ;;  %v2095_v56 = vld [vmem:[%s3769_s3 + $0x68] sm:$0xff] }
 0x237   :  { %2777 = vmatprep.subr.bf16.mxu1 %v3318_v62 }
 0x23a   :  { %2779 = vmatpush3.bf16.msra.mxu1 %v3318_v62  ;;  %v2096_v62 = vld [vmem:[%s3769_s3 + $0x70] sm:$0xff] }
 0x23b   :  { %2547 = vmatprep.subr.msk.mxu1 %vm192_vm3, %v3329_v5 }
 0x23e   :  { %2548 = vmatpush3.msk.msra.mxu1 %vm192_vm3, %v3329_v5  ;;  %v3420_v5 = vpack.c.bf16 %v2096_v62, %v2095_v56 }
 0x23f   :  { %2550 = vmatmul.mubr.msk.f32.vlgmr.msra.gmra.mrb[10].mxu1 %vm185_vm7, %v1478_v16  ;;  %2798 = vmatprep.subr.bf16.mxu1 %v2893_v7 }
 0x240   :  { %2593 = vmatprep.mubr.msk.f32.mxu1 %vm2895_vm12, %v2888_v10  ;;  %2666 = vmatpush3.bf16.msra.mxu0 %v3420_v5 }
 0x241   :  { %2667 = vmatprep.subr.bf16.mxu0 %v2893_v7 }
 0x244   :  { %2669 = vmatpush3.bf16.msra.mxu0 %v3426_v25 }
 0x245   :  { %2670 = vmatprep.subr.bf16.mxu0 %v2893_v7 }
 0x248   :  { %2672 = vmatpush3.bf16.msra.mxu0 %v3436_v28 }
 0x249   :  { %2673 = vmatprep.subr.bf16.mxu0 %v2893_v7 }
 0x24c   :  { %2675 = vmatpush3.bf16.msra.mxu0 %v3456_v11 }
 0x24d   :  { %2398 = vmatprep.subr.mxu0 %v2888_v10 }
 0x250   :  { %2399 = vmatpush3.msk.msra.mxu0 %vm192_vm3, %v3465_v14 }
 0x251   :  { %2692 = vmatprep.subr.bf16.mxu0 %v2893_v7 }
 0x2b8   :  { %v3441_v31 = vpop.f32.mrb[0].mxu1 }
 0x2b9   :  { %v2360_v32 = vpop.f32.mrb[1].mxu1 }
 0x2ca   :  { %v2381_v35 = vpop.f32.mrb[2].mxu1 }
 0x2cb   :  { %v521_v36 = vadd.f32 %v2381_v35, %v3446_v33  ;;  %v515_v37 = vpop.f32.mrb[3].mxu1 }
 0x2cc   :  { %v516_v9 = vadd.f32 %v3446_v33, %v515_v37 }
 0x2cd   :  { %vm525_vm14 = vcmp.ge.f32.partialorder %v521_v36, 0.0  ;;  %v527_v39 = vmul.f32 0.01, %v521_v36 }
 0x2ce   :  { %vm524_vm15 = vcmp.ge.f32.partialorder %v516_v9, 0.0  ;;  %v526_v40 = vmul.f32 0.01, %v516_v9 }
 0x2cf   :  { %v529_v41 = vsel %vm525_vm14, %v521_v36, %v527_v39 }
 0x2d0   :  { %531 = vst.msk [vmem:[#allocation3 + $0x9] sm:$0x3f] %vm117_vm1, %v529_v41  ;;  %v528_v42 = vsel %vm524_vm15, %v516_v9, %v526_v40 }
 0x2d1   :  { %530 = vst.msk [vmem:[#allocation3 + $0x1] sm:$0xff] %vm113_vm0, %v528_v42 }
 0x2d8   :  { %v535_v43 = vld [vmem:[#allocation3 + $0x4] ss:$2 sm:$0xf] }
 0x2d9   :  { %544 = vrot.lane.b32.xlu1 %v535_v43, %s2889_s23  ;;  %v534_v44 = vld [vmem:[#allocation3 + $0x2] ss:$2 sm:$0xf] }
 0x2da   :  { %540 = vrot.lane.b32.xlu0 %v534_v44, %s2890_s24  ;;  %v538_v51 = vld [vmem:[#allocation3 + $0x8] ss:$2 sm:$0xf]  ;;  %v3481_v58 = vld [vmem:[#allocation3] ss:$2 sm:$0xf] }
 0x2db   :  { %v537_v54 = vld [vmem:[#allocation3 + $0x6] ss:$2 sm:$0xf] }
 0x2dc   :  { %v2423_v21 = vpop.f32.mrb[4].mxu1 }
 0x2dd   :  { %v784_v52 = vadd.f32 %v2423_v21, %v3475_v49  ;;  %v778_v53 = vpop.f32.mrb[5].mxu1  ;;  %552 = vrot.lane.b32.xlu1 %v538_v51, %s2892_s27 }
 0x2de   :  { %v779_v24 = vadd.f32 %v3475_v49, %v778_v53  ;;  %548 = vrot.lane.b32.xlu0 %v537_v54, %s2891_s26 }
 0x2df   :  { %vm788_vm2 = vcmp.ge.f32.partialorder %v784_v52, 0.0  ;;  %v790_v55 = vmul.f32 0.01, %v784_v52 }
 0x2e0   :  { %vm787_vm9 = vcmp.ge.f32.partialorder %v779_v24, 0.0  ;;  %v789_v57 = vmul.f32 0.01, %v779_v24 }
 0x2e1   :  { %v792_v29 = vsel %vm788_vm2, %v784_v52, %v790_v55 }
 0x2e2   :  { %v791_v59 = vsel %vm787_vm9, %v779_v24, %v789_v57  ;;  %794 = vst.msk [vmem:[#allocation3 + $0x9] sm:$0x3f] %vm117_vm1, %v792_v29  ;;  %v2104_v57 = vld [vmem:[%s3769_s3 + $0xd0] sm:$0xff]  ;;  %v2105_v29 = vld [vmem:[%s3769_s3 + $0xd8] sm:$0xff] }
 0x2e3   :  { %793 = vst.msk [vmem:[#allocation3 + $0x1] sm:$0xff] %vm113_vm0, %v791_v59 }
 0x2ea   :  { %v798_v60 = vld [vmem:[#allocation3 + $0x2] ss:$2 sm:$0x1f]  ;;  %v797_v6 = vld [vmem:[#allocation3 + $0x1] ss:$2 sm:$0x1f] }
 0x2eb   :  { %810 = vrot.lane.b32.xlu1 %v798_v60, %s2889_s23  ;;  %806 = vrot.lane.b32.xlu0 %v797_v6, %s2890_s24  ;;  %v801_v63 = vld [vmem:[#allocation3 + $0x4] ss:$2 sm:$0x1f]  ;;  %v800_v30 = vld [vmem:[#allocation3 + $0x3] ss:$2 sm:$0x1f] }
 0x2ec   :  { %v804_v48 = vld [vmem:[#allocation3 + $0x6] ss:$2 sm:$0x1f]  ;;  %v803_v34 = vld [vmem:[#allocation3 + $0x5] ss:$2 sm:$0x1f] }
 0x2ed   :  { %v3492_v12 = vld [vmem:[#allocation3] ss:$2 sm:$0x1f] }
 0x2ee   :  { %v2473_v61 = vpop.f32.mrb[6].mxu1 }
 0x2ef   :  { %v1075_v23 = vadd.f32 %v2473_v61, %v3149_v20  ;;  %v1069_v0 = vpop.f32.mrb[7].mxu1  ;;  %818 = vrot.lane.b32.xlu1 %v801_v63, %s2892_s27  ;;  %814 = vrot.lane.b32.xlu0 %v800_v30, %s2891_s26  ;;  %v3530_v61 = vpack.c.bf16 %v2105_v29, %v2104_v57 }
 0x2f0   :  { %v1070_v1 = vadd.f32 %v3149_v20, %v1069_v0 }
 0x2f1   :  { %vm1079_vm11 = vcmp.ge.f32.partialorder %v1075_v23, 0.0  ;;  %v1081_v2 = vmul.f32 0.01, %v1075_v23 }
 0x2f2   :  { %vm1078_vm13 = vcmp.ge.f32.partialorder %v1070_v1, 0.0  ;;  %v1080_v3 = vmul.f32 0.01, %v1070_v1 }
 0x2f3   :  { %v1083_v4 = vsel %vm1079_vm11, %v1075_v23, %v1081_v2  ;;  %826 = vrot.lane.b32.xlu1 %v804_v48, %s2896_s2  ;;  %822 = vrot.lane.b32.xlu0 %v803_v34, %s2897_s19  ;;  %v2107_v23 = vld [vmem:[%s3769_s3 + $0xe8] sm:$0xff]  ;;  %v2109_v2 = vld [vmem:[%s3769_s3 + $0xf8] sm:$0xff]  ;;  %vm840_vm11 = vcmask 801792  }
 0x2f4   :  { %v1082_v13 = vsel %vm1078_vm13, %v1070_v1, %v1080_v3  ;;  %1085 = vst.msk [vmem:[#allocation3 + $0x9] sm:$0x3f] %vm117_vm1, %v1083_v4  ;;  %v2108_v1 = vld [vmem:[%s3769_s3 + $0xf0] sm:$0xff]  ;;  %v2110_v48 = vld [vmem:[%s3769_s3 + $0x100] sm:$0xff]  ;;  %v2111_v4 = vld [vmem:[%s3769_s3 + $0x108] sm:$0xff] }
 0x2f5   :  { %1084 = vst.msk [vmem:[#allocation3 + $0x1] sm:$0xff] %vm113_vm0, %v1082_v13  ;;  %v3554_v3 = vpack.c.bf16 %v2109_v2, %v2108_v1  ;;  %v3564_v34 = vpack.c.bf16 %v2111_v4, %v2110_v48 }
 0x2fc   :  { %v1088_v20 = vld [vmem:[#allocation3 + $0x8] ss:$2 sm:$0xf]  ;;  %v3501_v26 = vld [vmem:[#allocation3] ss:$2 sm:$0xf] }
 0x2fd   :  { %1094 = vrot.lane.b32.xlu1 %v1088_v20, %s2889_s23  ;;  %v1087_v45 = vld [vmem:[#allocation3 + $0x4] ss:$2 sm:$0xf]  ;;  %v2112_v20 = vld [vmem:[%s3769_s3 + $0x110] sm:$0xff] }
 0x2fe   :  { %1090 = vrot.lane.b32.xlu0 %v1087_v45, %s2890_s24  ;;  %v2113_v45 = vld [vmem:[%s3769_s3 + $0x118] sm:$0xff] }
 0x300   :  { %v2509_v50 = vpop.f32.mrb[8].mxu1 }
 0x301   :  { %v1310_v46 = vadd.f32 %v2509_v50, %v3446_v33  ;;  %v1304_v16 = vpop.f32.mrb[9].mxu1 }
 0x302   :  { %v1305_v56 = vadd.f32 %v3446_v33, %v1304_v16 }
 0x303   :  { %vm1314_vm14 = vcmp.ge.f32.partialorder %v1310_v46, 0.0  ;;  %v1316_v62 = vmul.f32 0.01, %v1310_v46 }
 0x304   :  { %vm1313_vm15 = vcmp.ge.f32.partialorder %v1305_v56, 0.0  ;;  %v1315_v17 = vmul.f32 0.01, %v1305_v56 }
 0x305   :  { %v1318_v22 = vsel %vm1314_vm14, %v1310_v46, %v1316_v62  ;;  %v3574_v46 = vpack.c.bf16 %v2113_v45, %v2112_v20  ;;  %v2115_v62 = vld [vmem:[%s3769_s3 + $0x128] sm:$0xff] }
 0x306   :  { %1320 = vst.msk [vmem:[#allocation3 + $0x9] sm:$0x3f] %vm117_vm1, %v1318_v22  ;;  %v1317_v27 = vsel %vm1313_vm15, %v1305_v56, %v1315_v17  ;;  %v2114_v56 = vld [vmem:[%s3769_s3 + $0x120] sm:$0xff] }
 0x307   :  { %1319 = vst.msk [vmem:[#allocation3 + $0x1] sm:$0xff] %vm113_vm0, %v1317_v27 }
 0x30e   :  { %v1323_v32 = vld [vmem:[#allocation3 + $0x4] ss:$2 sm:$0xf] }
 0x30f   :  { %1331 = vrot.lane.b32.xlu1 %v1323_v32, %s2889_s23  ;;  %v1322_v35 = vld [vmem:[#allocation3 + $0x2] ss:$2 sm:$0xf]  ;;  %v3587_v32 = vpack.c.bf16 %v2115_v62, %v2114_v56  ;;  %v1703_v62 = vlaneseq }
 0x310   :  { %1327 = vrot.lane.b32.xlu0 %v1322_v35, %s2890_s24  ;;  %v1325_v33 = vld [vmem:[#allocation3 + $0x8] ss:$2 sm:$0xf]  ;;  %v3511_v42 = vld [vmem:[#allocation3] ss:$2 sm:$0xf] }
 0x311   :  { %v1324_v38 = vld [vmem:[#allocation3 + $0x6] ss:$2 sm:$0xf] }
 0x312   :  { %v2551_v36 = vpop.f32.mrb[10].mxu1 }
 0x313   :  { %v1557_v37 = vadd.f32 %v2551_v36, %v3475_v49  ;;  %v1551_v9 = vpop.f32.mrb[11].mxu1  ;;  %1339 = vrot.lane.b32.xlu1 %v1325_v33, %s2892_s27 }
 0x314   :  { %v1552_v47 = vadd.f32 %v3475_v49, %v1551_v9  ;;  %1335 = vrot.lane.b32.xlu0 %v1324_v38, %s2891_s26  ;;  %v3598_v9 = vld [vmem:[%s3769_s3 + $0x130] sm:$0x3] }
 0x315   :  { %vm1561_vm2 = vcmp.ge.f32.partialorder %v1557_v37, 0.0  ;;  %v1563_v39 = vmul.f32 0.01, %v1557_v37 }
 0x316   :  { %vm1560_vm9 = vcmp.ge.f32.partialorder %v1552_v47, 0.0  ;;  %v1562_v40 = vmul.f32 0.01, %v1552_v47 }
 0x317   :  { %v1565_v41 = vsel %vm1561_vm2, %v1557_v37, %v1563_v39  ;;  %vm920_vm2 = vcmask 110592  }
 0x318   :  { %v1564_v43 = vsel %vm1560_vm9, %v1552_v47, %v1562_v40  ;;  %1567 = vst.msk [vmem:[#allocation3 + $0x9] sm:$0x3f] %vm117_vm1, %v1565_v41  ;;  %vm834_vm1 = vcmask 687104  }
 0x319   :  { %1566 = vst.msk [vmem:[#allocation3 + $0x1] sm:$0xff] %vm113_vm0, %v1564_v43 }
 0x320   :  { %v1570_v44 = vld [vmem:[#allocation3 + $0x2] ss:$2 sm:$0x1f]  ;;  %v1569_v21 = vld [vmem:[#allocation3 + $0x1] ss:$2 sm:$0x1f] }
 0x321   :  { %1580 = vrot.lane.b32.xlu1 %v1570_v44, %s2889_s23  ;;  %1576 = vrot.lane.b32.xlu0 %v1569_v21, %s2890_s24  ;;  %v1572_v49 = vld [vmem:[#allocation3 + $0x4] ss:$2 sm:$0x1f]  ;;  %v1571_v51 = vld [vmem:[#allocation3 + $0x3] ss:$2 sm:$0x1f] }
 0x322   :  { %v1574_v52 = vld [vmem:[#allocation3 + $0x6] ss:$2 sm:$0x1f]  ;;  %v1573_v53 = vld [vmem:[#allocation3 + $0x5] ss:$2 sm:$0x1f] }
 0x325   :  { %1588 = vrot.lane.b32.xlu1 %v1572_v49, %s2892_s27  ;;  %1584 = vrot.lane.b32.xlu0 %v1571_v51, %s2891_s26 }
 0x329   :  { %1596 = vrot.lane.b32.xlu1 %v1574_v52, %s2896_s2  ;;  %1592 = vrot.lane.b32.xlu0 %v1573_v53, %s2897_s19 }
 0x34b   :  { %v545_v54 = vpop.permute.xlu1 %544 }
 0x34c   :  { %v541_v24 = vpop.permute.xlu0 %540 }
 0x34d   :  { %v555_v55 = vsel %vm113_vm0, %v3481_v58, %v541_v24  ;;  %v2106_v58 = vld [vmem:[%s3769_s3 + $0xe0] sm:$0xff] }
 0x34e   :  { %v556_v6 = vsel %vm172_vm4, %v555_v55, %v545_v54  ;;  %v3542_v30 = vpack.c.bf16 %v2107_v23, %v2106_v58  ;;  %v2128_v58 = vld [vmem:[%s3770_s4 + $0x1] ss:$0 sm:$0xff] }
 0x34f   :  { %v553_v59 = vpop.permute.xlu1 %552 }
 0x350   :  { %v549_v60 = vpop.permute.xlu0 %548 }
 0x351   :  { %v557_v63 = vsel %vm175_vm5, %v556_v6, %v549_v60 }
 0x352   :  { %v558_v0 = vsel %vm178_vm6, %v557_v63, %v553_v59 }
 0x353   :  { %2401 = vmatmul.mubr.msk.f32.vlgmr.msra.gmra.mrb[2].mxu0 %vm185_vm7, %v558_v0 }
 0x354   :  { %2694 = vmatpush3.bf16.msra.mxu0 %v3530_v61  ;;  %2450 = vmatprep.mubr.msk.f32.mxu0 %vm2895_vm12, %v2888_v10 }
 0x355   :  { %2695 = vmatprep.subr.bf16.mxu0 %v2893_v7 }
 0x358   :  { %2697 = vmatpush3.bf16.msra.mxu0 %v3542_v30 }
 0x359   :  { %2698 = vmatprep.subr.bf16.mxu0 %v2893_v7 }
 0x35c   :  { %2700 = vmatpush3.bf16.msra.mxu0 %v3554_v3 }
 0x35d   :  { %v811_v13 = vpop.permute.xlu1 %810  ;;  %2701 = vmatprep.subr.bf16.mxu0 %v2893_v7  ;;  %v807_v50 = vpop.permute.xlu0 %806 }
 0x35e   :  { %v829_v16 = vsel %vm113_vm0, %v3492_v12, %v807_v50 }
 0x35f   :  { %v830_v27 = vsel %vm172_vm4, %v829_v16, %v811_v13 }
 0x360   :  { %2703 = vmatpush3.bf16.msra.mxu0 %v3564_v34 }
 0x361   :  { %2704 = vmatprep.subr.bf16.mxu0 %v2893_v7  ;;  %v815_v17 = vpop.permute.xlu0 %814  ;;  %v819_v22 = vpop.permute.xlu1 %818 }
 0x362   :  { %v831_v12 = vsel %vm175_vm5, %v830_v27, %v815_v17  ;;  %v1704_v27 = vshrl.u32 %v1703_v62, 7 }
 0x363   :  { %v832_v36 = vsel %vm178_vm6, %v831_v12, %v819_v22 }
 0x364   :  { %2706 = vmatpush3.bf16.msra.mxu0 %v3574_v46 }
 0x365   :  { %2707 = vmatprep.subr.bf16.mxu0 %v2893_v7  ;;  %v823_v35 = vpop.permute.xlu0 %822  ;;  %v827_v33 = vpop.permute.xlu1 %826 }
 0x366   :  { %v833_v37 = vsel %vm185_vm7, %v832_v36, %v823_v35  ;;  %v1705_v35 = vadd.s32 8, %v1704_v27  ;;  %v1706_v36 = vadd.s32 16, %v1704_v27 }
 0x367   :  { %v835_v38 = vsel %vm834_vm1, %v833_v37, %v827_v33  ;;  %v1707_v33 = vadd.s32 24, %v1704_v27 }
 0x368   :  { %2709 = vmatpush3.bf16.msra.mxu0 %v3587_v32  ;;  %vm1713_vm14 = vcmp.ge.s32.totalorder %v1705_v35, 14 }
 0x369   :  { %2448 = vmatprep.subr.mxu0 %v2888_v10  ;;  %vm1727_vm15 = vcmp.ge.s32.totalorder %v1707_v33, 28 }
 0x36c   :  { %2449 = vmatpush3.msk.msra.mxu0 %vm301_vm8, %v3598_v9 }
 0x36d   :  { %2451 = vmatmul.mubr.msk.f32.vlgmr.msra.gmra.mrb[4].mxu0 %vm840_vm11, %v835_v38  ;;  %2726 = vmatprep.subr.bf16.mxu0 %v2893_v7  ;;  %v2157_v38 = vadd.s32 4294967282, %v1706_v36 }
 0x36e   :  { %2728 = vmatpush3.bf16.msra.mxu0 %v3115_v8  ;;  %2486 = vmatprep.mubr.msk.f32.mxu0 %vm2895_vm12, %v2888_v10 }
 0x36f   :  { %2729 = vmatprep.subr.bf16.mxu0 %v2893_v7  ;;  %v1095_v39 = vpop.permute.xlu1 %1094 }
 0x370   :  { %v1091_v47 = vpop.permute.xlu0 %1090 }
 0x371   :  { %v1097_v40 = vsel %vm113_vm0, %v3501_v26, %v1091_v47 }
 0x372   :  { %2731 = vmatpush3.bf16.msra.mxu0 %v3125_v15  ;;  %v1098_v8 = vsel %vm172_vm4, %v1097_v40, %v1095_v39  ;;  %v2898_v40 = vmov 0  }
 0x373   :  { %2732 = vmatprep.subr.bf16.mxu0 %v2893_v7 }
 0x376   :  { %2735 = vmatpush3.bf16.msk.msra.mxu0 %vm3139_vm10, %v3135_v18 }
 0x377   :  { %2752 = vmatprep.subr.bf16.mxu0 %v2893_v7 }
 0x379   :  { %2487 = vmatmul.mubr.msk.f32.vlgmr.msra.gmra.mrb[6].mxu0 %vm175_vm5, %v1098_v8  ;;  %v1719_v8 = vsel %vm1713_vm14, 1, %v2898_v40 }
 0x37a   :  { %2754 = vmatpush3.bf16.msra.mxu0 %v3420_v5  ;;  %2528 = vmatprep.mubr.msk.f32.mxu0 %vm2895_vm12, %v2888_v10 }
 0x37b   :  { %2755 = vmatprep.subr.bf16.mxu0 %v2893_v7 }
 0x37e   :  { %2757 = vmatpush3.bf16.msra.mxu0 %v3426_v25 }
 0x37f   :  { %2758 = vmatprep.subr.bf16.mxu0 %v2893_v7 }
 0x381   :  { %v1332_v15 = vpop.permute.xlu1 %1331 }
 0x382   :  { %2760 = vmatpush3.bf16.msra.mxu0 %v3436_v28  ;;  %v1328_v18 = vpop.permute.xlu0 %1327 }
 0x383   :  { %v1342_v26 = vsel %vm113_vm0, %v3511_v42, %v1328_v18  ;;  %2761 = vmatprep.subr.bf16.mxu0 %v2893_v7  ;;  %v1743_v18 = vmul.u32 14, %v1719_v8 }
 0x384   :  { %v1343_v43 = vsel %vm172_vm4, %v1342_v26, %v1332_v15  ;;  %v1733_v15 = vsel %vm1727_vm15, 1, %v2898_v40 }
 0x385   :  { %v1340_v41 = vpop.permute.xlu1 %1339  ;;  %v1739_v26 = vadd.s32 1, %v1733_v15 }
 0x386   :  { %2763 = vmatpush3.bf16.msra.mxu0 %v3456_v11  ;;  %v1336_v5 = vpop.permute.xlu0 %1335 }
 0x387   :  { %v1344_v44 = vsel %vm175_vm5, %v1343_v43, %v1336_v5  ;;  %2526 = vmatprep.subr.mxu0 %v2888_v10  ;;  %v1711_v43 = vand.u32 127, %v1703_v62 }
 0x388   :  { %v1345_v25 = vsel %vm178_vm6, %v1344_v44, %v1340_v41  ;;  %v1756_v41 = vmul.u32 3, %v2157_v38  ;;  %v1749_v44 = vsub.s32 %v1705_v35, %v1743_v18 }
 0x38a   :  { %2527 = vmatpush3.msk.msra.mxu0 %vm192_vm3, %v3465_v14  ;;  %v1568_v14 = vld [vmem:[#allocation3] ss:$2 sm:$0x1f] }
 0x38b   :  { %2529 = vmatmul.mubr.msk.f32.vlgmr.msra.gmra.mrb[8].mxu0 %vm185_vm7, %v1345_v25  ;;  %2780 = vmatprep.subr.bf16.mxu0 %v2893_v7  ;;  %v1754_v25 = vmul.u32 3, %v1704_v27 }
 0x38c   :  { %2782 = vmatpush3.bf16.msra.mxu0 %v3530_v61  ;;  %2578 = vmatprep.mubr.msk.f32.mxu0 %vm2895_vm12, %v2888_v10 }
 0x38d   :  { %2783 = vmatprep.subr.bf16.mxu0 %v2893_v7  ;;  %vm1766_vm9 = vcmp.eq.s32.totalorder %v1711_v43, %v1754_v25 }
 0x390   :  { %2785 = vmatpush3.bf16.msra.mxu0 %v3542_v30 }
 0x391   :  { %2786 = vmatprep.subr.bf16.mxu0 %v2893_v7 }
 0x393   :  { %v1577_v28 = vpop.permute.xlu0 %1576  ;;  %v1581_v11 = vpop.permute.xlu1 %1580 }
 0x394   :  { %2788 = vmatpush3.bf16.msra.mxu0 %v3554_v3  ;;  %v1599_v21 = vsel %vm113_vm0, %v1568_v14, %v1577_v28  ;;  %v1745_v28 = vmul.u32 14, %v1739_v26  ;;  %v1762_v14 = vadd.s32 1, %v1756_v41 }
 0x395   :  { %2789 = vmatprep.subr.bf16.mxu0 %v2893_v7  ;;  %v1600_v51 = vsel %vm172_vm4, %v1599_v21, %v1581_v11 }
 0x396   :  { %v1751_v21 = vsub.s32 %v1707_v33, %v1745_v28 }
 0x397   :  { %v1585_v42 = vpop.permute.xlu0 %1584  ;;  %v1589_v49 = vpop.permute.xlu1 %1588 }
 0x398   :  { %2791 = vmatpush3.bf16.msra.mxu0 %v3564_v34  ;;  %v1601_v52 = vsel %vm175_vm5, %v1600_v51, %v1585_v42  ;;  %v1755_v42 = vmul.u32 3, %v1749_v44 }
 0x399   :  { %2792 = vmatprep.subr.bf16.mxu0 %v2893_v7  ;;  %v1602_v54 = vsel %vm178_vm6, %v1601_v52, %v1589_v49  ;;  %vm378_vm6 = vcmask 109568   ;;  %v1757_v52 = vmul.u32 3, %v1751_v21  ;;  %v1863_v21 = vld [vmem:[%s3771_s5 + $0x8] sm:$0xff] }
 0x39a   :  { %v1761_v51 = vadd.s32 %v1755_v42, %v1719_v8  ;;  %v1862_v42 = vld [vmem:[%s3771_s5] sm:$0xff] }
 0x39b   :  { %v1593_v53 = vpop.permute.xlu0 %1592  ;;  %v1597_v24 = vpop.permute.xlu1 %1596 }
 0x39c   :  { %2794 = vmatpush3.bf16.msra.mxu0 %v3574_v46  ;;  %v1603_v55 = vsel %vm185_vm7, %v1602_v54, %v1593_v53  ;;  %v2135_v46 = vld [vmem:[%s3770_s4 + $0x2] ss:$0 sm:$0xff]  ;;  %v1709_v53 = vadd.s32 40, %v1704_v27 }
 0x39d   :  { %2795 = vmatprep.subr.bf16.mxu0 %v2893_v7  ;;  %v1604_v57 = vsel %vm834_vm1, %v1603_v55, %v1597_v24  ;;  %vm1768_vm1 = vcmp.eq.s32.totalorder %v1711_v43, %v1762_v14  ;;  %v1763_v24 = vadd.s32 %v1757_v52, %v1739_v26  ;;  %v1708_v55 = vadd.s32 32, %v1704_v27 }
 0x3a0   :  { %2797 = vmatpush3.bf16.msra.mxu0 %v3587_v32 }
 0x3a1   :  { %2576 = vmatprep.subr.mxu0 %v2888_v10 }
 0x3a4   :  { %2577 = vmatpush3.msk.msra.mxu0 %vm301_vm8, %v3598_v9 }
 0x3a5   :  { %2579 = vmatmul.mubr.msk.f32.vlgmr.msra.gmra.mrb[10].mxu0 %vm840_vm11, %v1604_v57  ;;  %2818 = vmatprep.subr.bf16.mxu0 %v2893_v7  ;;  %vm1767_vm11 = vcmp.eq.s32.totalorder %v1711_v43, %v1761_v51  ;;  %v2159_v57 = vadd.s32 4294967268, %v1709_v53 }
 0x3a6   :  { %2619 = vmatprep.mubr.msk.f32.mxu0 %vm2895_vm12, %v2888_v10 }
 0x426   :  { %v635_v29 = vpop.f32.mrb[2].mxu0 }
 0x427   :  { %v2402_v59 = vpop.f32.mrb[3].mxu0  ;;  %v636_v23 = vadd.f32 %v2128_v58, %v635_v29 }
 0x429   :  { %v640_v0 = vmul.f32 0.01, %v636_v23  ;;  %vm639_vm3 = vcmp.ge.f32.partialorder %v636_v23, 0.0 }
 0x42b   :  { %v641_v30 = vsel %vm639_vm3, %v636_v23, %v640_v0  ;;  %vm2799_vm3 = vmpackc.low %vm1767_vm11, %vm1766_vm9 }
 0x42c   :  { %v642_v1 = vsel %vm378_vm6, %v641_v30, -inf }
 0x42d   :  { %v643_v3 = vrot.slane %v642_v1, 4 }
 0x42f   :  { %v644_v13 = vmax.f32 %v642_v1, %v643_v3 }
 0x431   :  { %v645_v56 = vrot.slane %v644_v13, 2 }
 0x433   :  { %v646_v12 = vmax.f32 %v644_v13, %v645_v56  ;;  %v2900_v13 = vmov 1.0  }
 0x435   :  { %v647_v39 = vrot.slane %v646_v12, 1 }
 0x437   :  { %v648_v11 = vmax.f32 %v646_v12, %v647_v39 }
 0x440   :  { %v913_v60 = vpop.f32.mrb[4].mxu0 }
 0x441   :  { %v2452_v6 = vpop.f32.mrb[5].mxu0  ;;  %v914_v17 = vadd.f32 %v2135_v46, %v913_v60 }
 0x442   :  { %v2899_v6 = vmov 1.0|1.0  }
 0x443   :  { %v918_v37 = vmul.f32 0.01, %v914_v17  ;;  %vm917_vm13 = vcmp.ge.f32.partialorder %v914_v17, 0.0  ;;  %2800 = vmatpush3.bf16.msk.msra.mxu1 %vm2799_vm3, %v2899_v6 }
 0x444   :  { %2801 = vmatprep.subr.bf16.mxu1 %v2893_v7 }
 0x445   :  { %v919_v5 = vsel %vm917_vm13, %v914_v17, %v918_v37 }
 0x446   :  { %v921_v49 = vsel %vm920_vm2, %v919_v5, -inf }
 0x447   :  { %v922_v29 = vrot.slane %v921_v49, 4 }
 0x449   :  { %v923_v1 = vmax.f32 %v921_v49, %v922_v29 }
 0x44c   :  { %v3664_v61 = vpop.f32.mrb[6].mxu0 }
 0x44d   :  { %v2488_v63 = vpop.f32.mrb[7].mxu0 }
 0x44e   :  { %v2158_v63 = vadd.s32 4294967268, %v1708_v55  ;;  %v1864_v55 = vld [vmem:[%s3771_s5 + $0x10] sm:$0xff] }
 0x450   :  { %v1758_v0 = vmul.u32 3, %v2158_v63 }
 0x45e   :  { %v1415_v2 = vpop.f32.mrb[8].mxu0 }
 0x45f   :  { %v1416_v48 = vadd.f32 %v2128_v58, %v1415_v2  ;;  %v2530_v4 = vpop.f32.mrb[9].mxu0  ;;  %v1759_v58 = vmul.u32 3, %v2159_v57  ;;  %v1865_v57 = vld [vmem:[%s3771_s5 + $0x18] sm:$0xff] }
 0x461   :  { %vm1419_vm7 = vcmp.ge.f32.partialorder %v1416_v48, 0.0  ;;  %v1420_v34 = vmul.f32 0.01, %v1416_v48  ;;  %v1765_v30 = vadd.s32 2, %v1759_v58 }
 0x463   :  { %v1421_v20 = vsel %vm1419_vm7, %v1416_v48, %v1420_v34  ;;  %vm1769_vm7 = vcmp.eq.s32.totalorder %v1711_v43, %v1763_v24  ;;  %v1764_v48 = vadd.s32 2, %v1758_v0  ;;  %vm1771_vm15 = vcmp.eq.s32.totalorder %v1711_v43, %v1765_v30  ;;  %v1957_v0 = vld [vmem:[%s3773_s7 + $0x8] sm:$0xff]  ;;  %v1958_v30 = vld [vmem:[%s3773_s7 + $0x10] sm:$0xff] }
 0x464   :  { %v1422_v45 = vsel %vm378_vm6, %v1421_v20, -inf  ;;  %vm2802_vm14 = vmpackc.low %vm1769_vm7, %vm1768_vm1  ;;  %v2165_v34 = vsel %vm1771_vm15, 1.0, %v2888_v10 }
 0x465   :  { %v1423_v50 = vrot.slane %v1422_v45, 4  ;;  %2803 = vmatpush3.bf16.msk.msra.mxu1 %vm2802_vm14, %v2899_v6  ;;  %vm1770_vm9 = vcmp.eq.s32.totalorder %v1711_v43, %v1764_v48  ;;  %v2805_v20 = vpack.c.bf16 %v2165_v34, %v2900_v13  ;;  %v1867_v6 = vld [vmem:[%s3771_s5 + $0x28] sm:$0x3] }
 0x466   :  { %2804 = vmatprep.subr.bf16.mxu1 %v2893_v7  ;;  %vm2806_vm1 = vmpackc.low %vm301_vm8, %vm1770_vm9 }
 0x467   :  { %v1424_v16 = vmax.f32 %v1422_v45, %v1423_v50  ;;  %v924_v50 = vrot.slane %v923_v1, 2 }
 0x469   :  { %v1425_v22 = vrot.slane %v1424_v16, 2  ;;  %2807 = vmatpush3.bf16.msk.msra.mxu1 %vm2806_vm1, %v2805_v20  ;;  %v925_v56 = vmax.f32 %v923_v1, %v924_v50  ;;  %v1959_v1 = vld [vmem:[%s3773_s7 + $0x18] sm:$0xff] }
 0x46a   :  { %2808 = vmatprep.subr.bf16.mxu1 %v2893_v7 }
 0x46b   :  { %v1426_v32 = vmax.f32 %v1424_v16, %v1425_v22  ;;  %v926_v22 = vrot.slane %v925_v56, 1 }
 0x46d   :  { %v1427_v9 = vrot.slane %v1426_v32, 1  ;;  %v927_v27 = vmax.f32 %v925_v56, %v926_v22 }
 0x46f   :  { %v1428_v47 = vmax.f32 %v1426_v32, %v1427_v9  ;;  %v2121_v32 = vld [vmem:[%s3770_s4] ss:$0 sm:$0xff] }
 0x470   :  { %v1169_v12 = vadd.f32 %v2121_v32, %v3664_v61  ;;  %v372_v35 = vadd.f32 %v2121_v32, %v3441_v31 }
 0x471   :  { %1689 = vrot.lane.b32.xlu0 %v1428_v47, %s2890_s24 }
 0x472   :  { %v1173_v36 = vmul.f32 0.01, %v1169_v12  ;;  %vm1172_vm8 = vcmp.ge.f32.partialorder %v1169_v12, 0.0  ;;  %v376_v33 = vmul.f32 0.01, %v372_v35 }
 0x474   :  { %v1174_v37 = vsel %vm1172_vm8, %v1169_v12, %v1173_v36 }
 0x475   :  { %929 = vrot.lane.b32.xlu0 %v648_v11, %s2890_s24  ;;  %v1175_v9 = vsel %vm378_vm6, %v1174_v37, -inf  ;;  %s2903_s24 = smov [#allocation7]  }
 0x476   :  { %v1176_v47 = vrot.slane %v1175_v9, 4  ;;  %s2061_s28 = sshll.u32 %s2903_s24, 4  ;;  %s2062_s28 = int_to_ptr.vmem [resolvable:$true] %s2061_s28 }
 0x478   :  { %v1674_v54 = vpop.f32.mrb[10].mxu0  ;;  %v1177_v8 = vmax.f32 %v1175_v9, %v1176_v47 }
 0x479   :  { %v1675_v59 = vadd.f32 %v2135_v46, %v1674_v54  ;;  %v2580_v60 = vpop.f32.mrb[11].mxu0  ;;  %v2809_v54 = vpack.c.bf16 %v1863_v21, %v1862_v42 }
 0x47a   :  { %v1178_v18 = vrot.slane %v1177_v8, 2  ;;  %v1866_v60 = vld [vmem:[%s3771_s5 + $0x20] sm:$0xff] }
 0x47b   :  { %vm1678_vm13 = vcmp.ge.f32.partialorder %v1675_v59, 0.0  ;;  %v1679_v23 = vmul.f32 0.01, %v1675_v59  ;;  %v2815_v63 = vpack.c.bf16 %v1867_v6, %v1866_v60 }
 0x47c   :  { %v1179_v41 = vmax.f32 %v1177_v8, %v1178_v18 }
 0x47d   :  { %v1680_v2 = vsel %vm1678_vm13, %v1675_v59, %v1679_v23  ;;  %v2812_v59 = vpack.c.bf16 %v1865_v57, %v1864_v55  ;;  %v1956_v23 = vld [vmem:[%s3773_s7] sm:$0xff]  ;;  %s2902_s7 = smov [#allocation5]  }
 0x47e   :  { %v1681_v3 = vsel %vm920_vm2, %v1680_v2, -inf  ;;  %vm375_vm2 = vcmp.ge.f32.partialorder %v372_v35, 0.0  ;;  %v1180_v61 = vrot.slane %v1179_v41, 1  ;;  %v2819_v19 = vpack.c.bf16 %v1957_v0, %v1956_v23  ;;  %s2051_s25 = sshll.u32 %s2902_s7, 4  ;;  %s2052_s25 = int_to_ptr.vmem [resolvable:$true] %s2051_s25 }
 0x47f   :  { %v1682_v4 = vrot.slane %v1681_v3, 4  ;;  %v377_v38 = vsel %vm375_vm2, %v372_v35, %v376_v33  ;;  %v2822_v2 = vpack.c.bf16 %v1959_v1, %v1958_v30  ;;  %p2845_p1 = scmp.lt.s32.totalorder %s2052_s25, %s2052_s25 }
 0x480   :  { %v379_v39 = vsel %vm378_vm6, %v377_v38, -inf  ;;  %v1181_v43 = vmax.f32 %v1179_v41, %v1180_v61  ;;  %vm1701_vm6 = vcmask 1040384   ;;  %2820 = vmatpush3.bf16.msra.mxu0 %v2819_v19 }
 0x481   :  { %v1683_v45 = vmax.f32 %v1681_v3, %v1682_v4  ;;  %v380_v40 = vrot.slane %v379_v39, 4  ;;  %2821 = vmatprep.subr.bf16.mxu0 %v2893_v7  ;;  %v2173_v3 = vld [vmem:[%s3772_s6] ss:$0 sm:$0xff]  ;;  %s2840_s6 = scalar_lea.vmem %s2052_s25, 32 }
 0x482   :  { %p2841_p0 = scmp.ne.s32.totalorder %s2052_s25, %s2840_s6  ;;  %p2846_p2 = scmp.lt.s32.totalorder %s2840_s6, %s2840_s6 }
 0x483   :  { %v1684_v46 = vrot.slane %v1683_v45, 2  ;;  %v381_v15 = vmax.f32 %v379_v39, %v380_v40 }
 0x484   :  { %2823 = vmatpush3.bf16.msra.mxu0 %v2822_v2  ;;  %p2847_p3 = por %p2846_p2, %p2845_p1 }
 0x485   :  { %v1685_v16 = vmax.f32 %v1683_v45, %v1684_v46  ;;  %v382_v26 = vrot.slane %v381_v15, 2 }
 0x486   :  { %p2848_p4 = pnand %p2847_p3, %p2841_p0 }
 0x487   :  { %v1686_v62 = vrot.slane %v1685_v16, 1  ;;  %v383_v5 = vmax.f32 %v381_v15, %v382_v26 }
 0x489   :  { %v1687_v17 = vmax.f32 %v1685_v16, %v1686_v62  ;;  %v384_v44 = vrot.slane %v383_v5, 1 }
 0x48b   :  { %1693 = vrot.lane.b32.xlu1 %v1687_v17, %s2889_s23  ;;  %v385_v49 = vmax.f32 %v383_v5, %v384_v44 }
 0x48f   :  { %933 = vrot.lane.b32.xlu1 %v927_v27, %s2889_s23 }
 0x4e3   :  { %v1690_v31 = vpop.permute.xlu0 %1689 }
 0x4e4   :  { %v1696_v25 = vsel %vm113_vm0, %v1181_v43, %v1690_v31 }
 0x4e7   :  { %v930_v11 = vpop.permute.xlu0 %929 }
 0x4e8   :  { %v936_v51 = vsel %vm113_vm0, %v385_v49, %v930_v11  ;;  %vm1860_vm0 = vcmask 336896  }
 0x4fd   :  { %v1694_v28 = vpop.permute.xlu1 %1693 }
 0x4fe   :  { %v1697_v14 = vsel %vm172_vm4, %v1696_v25, %v1694_v28 }
 0x4ff   :  { %v1699_v52 = vrot.slane %v1697_v14, 7 }
 0x501   :  { %v934_v53 = vpop.permute.xlu1 %933 }
 0x502   :  { %v937_v24 = vsel %vm172_vm4, %v936_v51, %v934_v53  ;;  %vm1951_vm4 = vcmask 517120  }
 0x503   :  { %v1702_v29 = vsel %vm1701_vm6, %v937_v24, %v1699_v52 }
 0x504   :  { %2594 = vmatmul.mubr.msk.f32.vlgmr.msra.gmra.mrb[12].mxu1 %vm175_vm5, %v1702_v29 }
 0x505   :  { %2810 = vmatpush3.bf16.msra.mxu1 %v2809_v54  ;;  %2608 = vmatprep.mubr.msk.f32.mxu1 %vm2895_vm12, %v2888_v10 }
 0x506   :  { %2811 = vmatprep.subr.bf16.mxu1 %v2893_v7 }
 0x509   :  { %2813 = vmatpush3.bf16.msra.mxu1 %v2812_v59 }
 0x50a   :  { %2814 = vmatprep.subr.bf16.mxu1 %v2893_v7 }
 0x50d   :  { %2817 = vmatpush3.bf16.msk.msra.mxu1 %vm3139_vm10, %v2815_v63  ;;  %vm1970_vm10 = vcmask 261120  }
 0x5d7   :  { %v1856_v58 = vpop.f32.mrb[12].mxu1 }
 0x5d8   :  { %v2595_v10 = vpop.f32.mrb[13].mxu1  ;;  %2609 = vmatmul.mubr.msk.f32.vlgmr.msra.gmra.mrb[14].mxu1 %vm175_vm5, %v1856_v58  ;;  %1861 = vst.msk [vmem:[#allocation5] sm:$0x3] %vm1860_vm0, %v1856_v58 }
 0x6ab   :  { %v1947_v48 = vpop.f32.mrb[14].mxu1 }
 0x6ac   :  { %v1948_v4 = vadd.f32 %v2173_v3, %v1947_v48  ;;  %v2610_v34 = vpop.f32.mrb[15].mxu1 }
 0x6ae   :  { %vm1953_vm5 = vcmp.ge.f32.partialorder %v1948_v4, 0.0  ;;  %v1954_v13 = vmul.f32 0.01, %v1948_v4  ;;  %1952 = vst.msk [vmem:[#allocation7] sm:$0x3] %vm1951_vm4, %v1948_v4 }
 0x6b0   :  { %v1955_v20 = vsel %vm1953_vm5, %v1948_v4, %v1954_v13 }
 0x6b1   :  { %1968 = vrot.lane.b32.xlu0 %v1955_v20, %s2901_s8 }
 0x723   :  { %v1969_v45 = vpop.permute.xlu0 %1968 }
 0x724   :  { %2620 = vmatmul.mubr.msk.f32.vlgmr.msra.gmra.mrb[12].mxu0 %vm1970_vm10, %v1969_v45 }
 0x725   :  { %2851 = shalt.err (!%p2848_p4)
}
 0x726   :  { %s2852_s29 = scalar_lea.hbm %s3775_s9, 32 }
 0x727   :  { %p2853_p5 = scmp.ne.s32.totalorder %s3775_s9, %s2852_s29  ;;  %p2856_p6 = scmp.lt.u32.totalorder %s2852_s29, %s3775_s9 }
 0x729   :  { %p2858_p7 = pnand %p2856_p6, %p2853_p5 }
 0x72b   :  { %2861 = shalt.err (!%p2858_p7)
}
 0x72c   :  { %2054 = dma.vmem_to_hbm [thread:$0]  %s2052_s25, 32, %s3775_s9, [#allocation6]  }
 0x72d   :  { %s2862_s16 = scalar_lea.vmem %s2062_s28, 32  ;;  %p2867_p9 = scmp.lt.s32.totalorder %s2062_s28, %s2062_s28 }
 0x72e   :  { %p2863_p8 = scmp.ne.s32.totalorder %s2062_s28, %s2862_s16  ;;  %p2868_p10 = scmp.lt.s32.totalorder %s2862_s16, %s2862_s16 }
 0x730   :  { %p2869_p11 = por %p2868_p10, %p2867_p9 }
 0x732   :  { %p2870_p12 = pnand %p2869_p11, %p2863_p8 }
 0x734   :  { %2873 = shalt.err (!%p2870_p12)
}
 0x735   :  { %s2874_s2 = scalar_lea.hbm %s3776_s10, 32 }
 0x736   :  { %p2875_p13 = scmp.ne.s32.totalorder %s3776_s10, %s2874_s2  ;;  %p2878_p0 = scmp.lt.u32.totalorder %s2874_s2, %s3776_s10 }
 0x738   :  { %p2880_p1 = pnand %p2878_p0, %p2875_p13 }
 0x73a   :  { %2883 = shalt.err (!%p2880_p1)
}
 0x73b   :  { %2064 = dma.vmem_to_hbm [thread:$0]  %s2062_s28, 32, %s3776_s10, [#allocation8]   ;;  %v2176_v7 = vld [vmem:[#allocation4] ss:$0 sm:$0xff]  ;;  %vm2043_vm12 = vcmask 1024  }
 0x7f7   :  { %v2039_v50 = vpop.f32.mrb[12].mxu0 }
 0x7f8   :  { %v2040_v46 = vadd.f32 %v2176_v7, %v2039_v50  ;;  %v2621_v16 = vpop.f32.mrb[13].mxu0 }
 0x7fa   :  { %2044 = vst.msk [vmem:[%s3777_s11] sm:$0x3] %vm2043_vm12, %v2040_v46 }
 0x7fb   :  { %2884 = dma.done.wait [#allocation6], 32  }
 0x7fc   :  { %2885 = vsyncadd [#allocation6], 4294967264 }
 0x7fd   :  { %2886 = dma.done.wait [#allocation8], 32  }
 0x7fe   :  { %2887 = vsyncadd [#allocation8], 4294967264 }
 0x7ff   :  { %2075 = vsyncpa [#allocation6], 1 }
 0x800   :  { %2076 = vsyncpa [#allocation8], 1 }

</bundles_post_ra>
